<compile_context>
chip_gen: v7x
topology: tpu7x:2x2x1
jax: 0.10.0
libtpu: 0.0.40
codegen_flags: <defaults>
</compile_context>

<pallas_src>
import functools
import math

import jax
import jax.numpy as jnp
from jax.experimental import pallas as pl
from jax.experimental.pallas import tpu as pltpu


# ----------------------------------------------------------------------------
# Pallas kernel: one SAGEConvNew layer (+ fused activation epilogue)
# ----------------------------------------------------------------------------

def _sage_conv_new_kernel(x_ref, s_ref, t_ref, tt_ref, dinv_ref,
                          w1_ref, attl_ref, attr_ref,
                          wp_ref, bp_ref, wn_ref, bn_ref, wr_ref,
                          out_ref, sigma_ref,
                          vl_ref, sigr_ref, acc_ref, accw_ref,
                          *, negative_slope, activation):
    """Grid axis 0 = edge tiles (reduction axis, 'arbitrary').

    x_ref     : [N, F]    node features (resident)
    s_ref     : [TE, N]   one-hot edge sources, tile k
    t_ref     : [TE, N]   one-hot edge targets, tile k
    tt_ref    : [N, TE]   pre-transposed targets, tile k (no in-kernel transpose)
    dinv_ref  : [N, 1]    1 / max(in_degree, 1)
    w1_ref    : [F, C]    lin_1 weight^T (no bias)
    attl/attr : [1, C]
    wp/bp     : [F, C/2], [1, C/2]   lin_p
    wn/bn     : [F, C/2], [1, C/2]   lin_n
    wr_ref    : [F, C]    lin_r (root, no bias)
    out_ref   : [N, C]    written on last edge tile only
    sigma_ref : [TE, 1]   per-edge gate for tile k
    scratch   : vl [F,1], sigr [N,1], acc [N,F], accw [N,1]
    """
    k = pl.program_id(0)
    nfeat = x_ref.shape[1]

    @pl.when(k == 0)
    def _init():
        # Fold the attention dot into the weights (algebraically identical):
        #   sigma_l = (x @ w1 * att_l).sum(-1) = x @ (w1 * att_l).sum(-1)
        vl_ref[...] = jnp.sum(w1_ref[...] * attl_ref[...], axis=1, keepdims=True)
        v_r = jnp.sum(w1_ref[...] * attr_ref[...], axis=1, keepdims=True)
        sigr_ref[...] = jnp.dot(x_ref[...], v_r,
                                preferred_element_type=jnp.float32)       # [N, 1]
        acc_ref[...] = jnp.zeros_like(acc_ref)
        accw_ref[...] = jnp.zeros_like(accw_ref)

    # ---- per-edge-tile work ------------------------------------------------
    # Gather source features once; recover sigma_l per edge from the gather.
    x_src = jnp.dot(s_ref[...], x_ref[...],
                    preferred_element_type=jnp.float32)                    # [TE, F]
    sl_e = jnp.dot(x_src, vl_ref[...],
                   preferred_element_type=jnp.float32)                     # [TE, 1]
    sr_e = jnp.dot(t_ref[...], sigr_ref[...],
                   preferred_element_type=jnp.float32)                     # [TE, 1]

    s_e = sl_e + sr_e
    s_e = jnp.where(s_e > 0, s_e, negative_slope * s_e)                    # leaky_relu
    sigma_e = 1.0 / (1.0 + jnp.exp(-s_e))                                  # sigmoid
    sigma_ref[...] = sigma_e

    # Positive messages: scatter x_j * sigma onto targets (accumulate across tiles).
    acc_ref[...] += jnp.dot(tt_ref[...], x_src * sigma_e,
                            preferred_element_type=jnp.float32)            # [N, F]
    # Negative messages: T^T @ ((T@x)*(1-sigma)) == (T^T @ (1-sigma)) * x,
    # so only a per-node scalar weight needs to be accumulated.
    accw_ref[...] += jnp.dot(tt_ref[...], 1.0 - sigma_e,
                             preferred_element_type=jnp.float32)           # [N, 1]

    # ---- finalize on the last edge tile (dinv applied only here) -----------
    @pl.when(k == pl.num_programs(0) - 1)
    def _finalize():
        x = x_ref[...]
        dinv = dinv_ref[...]
        agg_p = acc_ref[...] * dinv                                        # mean agg
        agg_n = (accw_ref[...] * dinv) * x                                 # simplified agg2
        out = jnp.concatenate(
            [jnp.dot(agg_p, wp_ref[...], preferred_element_type=jnp.float32)
             + bp_ref[...],
             jnp.dot(agg_n, wn_ref[...], preferred_element_type=jnp.float32)
             + bn_ref[...]],
            axis=-1)                                                       # [N, C]
        out = out + jnp.dot(x, wr_ref[...], preferred_element_type=jnp.float32)

        if activation == "relu":
            out = jnp.maximum(out, 0.0)
        elif activation == "log_softmax":
            m = jnp.max(out, axis=-1, keepdims=True)
            z = out - m
            out = z - jnp.log(jnp.sum(jnp.exp(z), axis=-1, keepdims=True))
        out_ref[...] = out


# ----------------------------------------------------------------------------
# Wrapper
# ----------------------------------------------------------------------------

def sage_conv_new(x, src_onehot, dst_onehot, dst_onehot_t, deg_inv, params,
                  *, activation=None, negative_slope=0.2, edge_tile=128):
    """Pallas SAGEConvNew.forward (+ fused activation) -> (out [N,C], sigma [E])."""
    N, F = x.shape
    E = src_onehot.shape[0]
    C = params["w1"].shape[1]
    Ch = params["wp"].shape[1]
    assert E % edge_tile == 0, "pad E to a multiple of edge_tile"
    # TODO(synk): general E requires padding the edge axis + masking the tail tile.
    grid = (E // edge_tile,)

    kernel = functools.partial(_sage_conv_new_kernel,
                               negative_slope=negative_slope,
                               activation=activation)

    out, sigma = pl.pallas_call(
        kernel,
        grid=grid,
        in_specs=[
            pl.BlockSpec((N, F), lambda k: (0, 0)),            # x (resident)
            pl.BlockSpec((edge_tile, N), lambda k: (k, 0)),    # S tile
            pl.BlockSpec((edge_tile, N), lambda k: (k, 0)),    # T tile
            pl.BlockSpec((N, edge_tile), lambda k: (0, k)),    # T^T tile
            pl.BlockSpec((N, 1), lambda k: (0, 0)),            # deg_inv
            pl.BlockSpec((F, C), lambda k: (0, 0)),            # w1
            pl.BlockSpec((1, C), lambda k: (0, 0)),            # att_l
            pl.BlockSpec((1, C), lambda k: (0, 0)),            # att_r
            pl.BlockSpec((F, Ch), lambda k: (0, 0)),           # wp
            pl.BlockSpec((1, Ch), lambda k: (0, 0)),           # bp
            pl.BlockSpec((F, Ch), lambda k: (0, 0)),           # wn
            pl.BlockSpec((1, Ch), lambda k: (0, 0)),           # bn
            pl.BlockSpec((F, C), lambda k: (0, 0)),            # wr
        ],
        out_specs=(
            pl.BlockSpec((N, C), lambda k: (0, 0)),            # out (revisited)
            pl.BlockSpec((edge_tile, 1), lambda k: (k, 0)),    # sigma tile
        ),
        out_shape=(jax.ShapeDtypeStruct((N, C), jnp.float32),
                   jax.ShapeDtypeStruct((E, 1), jnp.float32)),
        scratch_shapes=[
            pltpu.VMEM((F, 1), jnp.float32),   # v_l  = (w1*att_l).sum(-1)
            pltpu.VMEM((N, 1), jnp.float32),   # sigma_r per node
            pltpu.VMEM((N, F), jnp.float32),   # positive-message accumulator
            pltpu.VMEM((N, 1), jnp.float32),   # sum of (1-sigma) per target node
        ],
        compiler_params=pltpu.CompilerParams(
            dimension_semantics=("arbitrary",)),   # edge axis is a reduction
    )(x, src_onehot, dst_onehot, dst_onehot_t, deg_inv,
      params["w1"], params["att_l"], params["att_r"],
      params["wp"], params["bp"], params["wn"], params["bn"], params["wr"])
    return out, sigma[:, 0]


def graph_sage_forward(x, src_onehot, dst_onehot, dst_onehot_t, deg_inv,
                       params1, params2, *, edge_tile=128):
    """GraphSage.forward with aug=True (eval mode); relu / log_softmax fused."""
    h, sigma1 = sage_conv_new(x, src_onehot, dst_onehot, dst_onehot_t, deg_inv,
                              params1, activation="relu", edge_tile=edge_tile)
    # TODO(synk): F.dropout is identity in eval mode; training-mode RNG masking omitted.
    logp, sigma2 = sage_conv_new(h, src_onehot, dst_onehot, dst_onehot_t, deg_inv,
                                 params2, activation="log_softmax",
                                 edge_tile=edge_tile)
    return logp, (sigma1, sigma2)


# ----------------------------------------------------------------------------
# Parameter init (deterministic glorot-style uniform, matching SAGEConvNew)
# ----------------------------------------------------------------------------

def _glorot(key, fan_in, fan_out):
    stdv = math.sqrt(6.0 / (fan_in + fan_out))
    return jax.random.uniform(key, (fan_in, fan_out), jnp.float32, -stdv, stdv)


def init_sage_params(key, in_channels, out_channels):
    assert out_channels % 2 == 0
    # TODO(synk): odd out_channels branch (out += lin_n(out_)) not implemented.
    half = out_channels // 2
    ks = jax.random.split(key, 8)
    return {
        "w1":    _glorot(ks[0], in_channels, out_channels),   # lin_1 (no bias)
        "att_l": _glorot(ks[1], 1, out_channels),
        "att_r": _glorot(ks[2], 1, out_channels),
        "wp":    _glorot(ks[3], in_channels, half),            # lin_p
        "bp":    _glorot(ks[4], 1, half),
        "wn":    _glorot(ks[5], in_channels, half),            # lin_n
        "bn":    _glorot(ks[6], 1, half),
        "wr":    _glorot(ks[7], in_channels, out_channels),    # lin_r (no bias)
        # lin_l / lin_2 are defined in __init__ but unused in forward -> omitted.
    }


# ----------------------------------------------------------------------------
# Pure-JAX reference (gather / segment-sum semantics, PyG-style scatter-mean)
# ----------------------------------------------------------------------------

def _ref_layer(x, src, dst, n_nodes, p, slope=0.2):
    h = x @ p["w1"]
    sig_l = (h * p["att_l"]).sum(-1)
    sig_r = (h * p["att_r"]).sum(-1)
    s = sig_l[src] + sig_r[dst]
    s = jnp.where(s > 0, s, slope * s)
    sigma = jax.nn.sigmoid(s)
    deg = jax.ops.segment_sum(jnp.ones_like(sigma), dst, num_segments=n_nodes)
    dinv = 1.0 / jnp.maximum(deg, 1.0)
    agg1 = jax.ops.segment_sum(x[src] * sigma[:, None], dst,
                               num_segments=n_nodes) * dinv[:, None]
    out_p = agg1 @ p["wp"] + p["bp"]
    agg2 = jax.ops.segment_sum(x[dst] * (1.0 - sigma)[:, None], dst,
                               num_segments=n_nodes) * dinv[:, None]
    out_n = agg2 @ p["wn"] + p["bn"]
    out = jnp.concatenate([out_p, out_n], axis=-1) + x @ p["wr"]
    return out, sigma


def _ref_forward(x, src, dst, n_nodes, p1, p2):
    h, s1 = _ref_layer(x, src, dst, n_nodes, p1)
    h = jax.nn.relu(h)
    h, s2 = _ref_layer(h, src, dst, n_nodes, p2)
    return jax.nn.log_softmax(h, axis=1), (s1, s2)


# ----------------------------------------------------------------------------
# Main
# ----------------------------------------------------------------------------

if __name__ == "__main__":
    N = 16     # nodes
    F_IN = 8   # num_node_features
    E = 256    # edges (multiple of edge tile)
    D = 32     # dim_size (hidden)
    K = 4      # num_classes
    TE = 128   # edge tile -> grid of 2 edge tiles (exercises the accumulation)

    key = jax.random.PRNGKey(0)
    kx, ke, kp1, kp2 = jax.random.split(key, 4)

    x = jax.random.normal(kx, (N, F_IN), jnp.float32)
    edge_index = jax.random.randint(ke, (2, E), 0, N, jnp.int32)
    src, dst = edge_index[0], edge_index[1]

    # Dense edge incidence (glue): one-hot source / target matrices.
    src_onehot = jax.nn.one_hot(src, N, dtype=jnp.float32)    # [E, N]
    dst_onehot = jax.nn.one_hot(dst, N, dtype=jnp.float32)    # [E, N]
    dst_onehot_t = dst_onehot.T                               # [N, E] (pre-transposed once)
    deg = dst_onehot.sum(axis=0)                              # in-degree per node
    deg_inv = (1.0 / jnp.maximum(deg, 1.0)).reshape(N, 1)

    params1 = init_sage_params(kp1, F_IN, D)
    params2 = init_sage_params(kp2, D, K)

    logp, (sigma1, sigma2) = graph_sage_forward(
        x, src_onehot, dst_onehot, dst_onehot_t, deg_inv, params1, params2,
        edge_tile=TE)
    jax.block_until_ready(logp)
    jax.block_until_ready(sigma1)
    jax.block_until_ready(sigma2)

    # Sanity check against pure-JAX reference.
    logp_ref, (s1_ref, s2_ref) = _ref_forward(x, src, dst, N, params1, params2)
    assert logp.shape == (N, K) and sigma1.shape == (E,) and sigma2.shape == (E,)
    assert jnp.allclose(logp, logp_ref, atol=1e-4, rtol=1e-4)
    assert jnp.allclose(sigma1, s1_ref, atol=1e-4, rtol=1e-4)
    assert jnp.allclose(sigma2, s2_ref, atol=1e-4, rtol=1e-4)

    print("KERNEL_OK")
</pallas_src>

<mosaic_0001>
module attributes {stable_mosaic.version = 11 : i64} {
  func.func @_sage_conv_new_kernel(%arg0: i32, %arg1: memref<16x8xf32, #tpu.memory_space<vmem>>, %arg2: memref<128x16xf32, #tpu.memory_space<vmem>>, %arg3: memref<128x16xf32, #tpu.memory_space<vmem>>, %arg4: memref<16x128xf32, #tpu.memory_space<vmem>>, %arg5: memref<16x1xf32, #tpu.memory_space<vmem>>, %arg6: memref<8x32xf32, #tpu.memory_space<vmem>>, %arg7: memref<1x32xf32, #tpu.memory_space<vmem>>, %arg8: memref<1x32xf32, #tpu.memory_space<vmem>>, %arg9: memref<8x16xf32, #tpu.memory_space<vmem>>, %arg10: memref<1x16xf32, #tpu.memory_space<vmem>>, %arg11: memref<8x16xf32, #tpu.memory_space<vmem>>, %arg12: memref<1x16xf32, #tpu.memory_space<vmem>>, %arg13: memref<8x32xf32, #tpu.memory_space<vmem>>, %arg14: memref<16x32xf32, #tpu.memory_space<vmem>>, %arg15: memref<128x1xf32, #tpu.memory_space<vmem>>, %arg16: memref<8x1xf32, #tpu.memory_space<vmem>>, %arg17: memref<16x1xf32, #tpu.memory_space<vmem>>, %arg18: memref<16x8xf32, #tpu.memory_space<vmem>>, %arg19: memref<16x1xf32, #tpu.memory_space<vmem>>) attributes {dimension_semantics = [#tpu.dimension_semantics<arbitrary>], iteration_bounds = array<i64: 2>, scalar_prefetch = 0 : i64, scratch_operands = 4 : i64, tpu.core_type = #tpu.core_type<tc>, window_params = [{pipeline_mode = #tpu.pipeline_mode<synchronous>, transform_indices = @transform_0, window_bounds = array<i64: 16, 8>}, {transform_indices = @transform_1, window_bounds = array<i64: 128, 16>}, {transform_indices = @transform_2, window_bounds = array<i64: 128, 16>}, {transform_indices = @transform_3, window_bounds = array<i64: 16, 128>}, {pipeline_mode = #tpu.pipeline_mode<synchronous>, transform_indices = @transform_4, window_bounds = array<i64: 16, 1>}, {pipeline_mode = #tpu.pipeline_mode<synchronous>, transform_indices = @transform_5, window_bounds = array<i64: 8, 32>}, {pipeline_mode = #tpu.pipeline_mode<synchronous>, transform_indices = @transform_6, window_bounds = array<i64: 1, 32>}, {pipeline_mode = #tpu.pipeline_mode<synchronous>, transform_indices = @transform_7, window_bounds = array<i64: 1, 32>}, {pipeline_mode = #tpu.pipeline_mode<synchronous>, transform_indices = @transform_8, window_bounds = array<i64: 8, 16>}, {pipeline_mode = #tpu.pipeline_mode<synchronous>, transform_indices = @transform_9, window_bounds = array<i64: 1, 16>}, {pipeline_mode = #tpu.pipeline_mode<synchronous>, transform_indices = @transform_10, window_bounds = array<i64: 8, 16>}, {pipeline_mode = #tpu.pipeline_mode<synchronous>, transform_indices = @transform_11, window_bounds = array<i64: 1, 16>}, {pipeline_mode = #tpu.pipeline_mode<synchronous>, transform_indices = @transform_12, window_bounds = array<i64: 8, 32>}, {pipeline_mode = #tpu.pipeline_mode<synchronous>, transform_indices = @transform_13, window_bounds = array<i64: 16, 32>}, {transform_indices = @transform_14, window_bounds = array<i64: 128, 1>}]} {
    %c0_i32 = arith.constant 0 : i32
    %0 = arith.cmpi eq, %arg0, %c0_i32 : i32
    %1 = arith.extui %0 : i1 to i32
    %c0_i32_0 = arith.constant 0 : i32
    %2 = arith.cmpi ne, %1, %c0_i32_0 : i32
    scf.if %2 {
      %c0_35 = arith.constant 0 : index
      %c0_36 = arith.constant 0 : index
      %42 = vector.load %arg6[%c0_35, %c0_36] : memref<8x32xf32, #tpu.memory_space<vmem>>, vector<8x32xf32>
      %c0_37 = arith.constant 0 : index
      %c0_38 = arith.constant 0 : index
      %43 = vector.load %arg7[%c0_37, %c0_38] : memref<1x32xf32, #tpu.memory_space<vmem>>, vector<1x32xf32>
      %44 = vector.broadcast %43 : vector<1x32xf32> to vector<8x32xf32>
      %45 = arith.mulf %42, %44 : vector<8x32xf32>
      %cst_39 = arith.constant dense<0.000000e+00> : vector<8xf32>
      %46 = vector.multi_reduction <add>, %45, %cst_39 [1] : vector<8x32xf32> to vector<8xf32>
      %47 = vector.shape_cast %46 : vector<8xf32> to vector<8x1xf32>
      %c0_40 = arith.constant 0 : index
      %c0_41 = arith.constant 0 : index
      %48 = vector.load %arg16[%c0_40, %c0_41] : memref<8x1xf32, #tpu.memory_space<vmem>>, vector<8x1xf32>
      tpu.vector_store %arg16[%c0_40, %c0_41], %47 {strides = array<i32>} : memref<8x1xf32, #tpu.memory_space<vmem>>, vector<8x1xf32>,
      %c0_42 = arith.constant 0 : index
      %c0_43 = arith.constant 0 : index
      %49 = vector.load %arg6[%c0_42, %c0_43] : memref<8x32xf32, #tpu.memory_space<vmem>>, vector<8x32xf32>
      %c0_44 = arith.constant 0 : index
      %c0_45 = arith.constant 0 : index
      %50 = vector.load %arg8[%c0_44, %c0_45] : memref<1x32xf32, #tpu.memory_space<vmem>>, vector<1x32xf32>
      %51 = vector.broadcast %50 : vector<1x32xf32> to vector<8x32xf32>
      %52 = arith.mulf %49, %51 : vector<8x32xf32>
      %cst_46 = arith.constant dense<0.000000e+00> : vector<8xf32>
      %53 = vector.multi_reduction <add>, %52, %cst_46 [1] : vector<8x32xf32> to vector<8xf32>
      %54 = vector.shape_cast %53 : vector<8xf32> to vector<8x1xf32>
      %c0_47 = arith.constant 0 : index
      %c0_48 = arith.constant 0 : index
      %55 = vector.load %arg1[%c0_47, %c0_48] : memref<16x8xf32, #tpu.memory_space<vmem>>, vector<16x8xf32>
      %cst_49 = arith.constant dense<0.000000e+00> : vector<16x1xf32>
      %56 = tpu.matmul %55, %54, %cst_49 {dimension_numbers = #tpu.dot_dimension_numbers<[1], [0], [0], [1], [0, 0, 1, 1], [], []>} : vector<16x8xf32>, vector<8x1xf32>, vector<16x1xf32> -> vector<16x1xf32>
      %c0_50 = arith.constant 0 : index
      %c0_51 = arith.constant 0 : index
      %57 = vector.load %arg17[%c0_50, %c0_51] : memref<16x1xf32, #tpu.memory_space<vmem>>, vector<16x1xf32>
      tpu.vector_store %arg17[%c0_50, %c0_51], %56 {strides = array<i32>} : memref<16x1xf32, #tpu.memory_space<vmem>>, vector<16x1xf32>,
      %cst_52 = arith.constant 0.000000e+00 : f32
      %58 = vector.broadcast %cst_52 : f32 to vector<16x8xf32>
      %c0_53 = arith.constant 0 : index
      %c0_54 = arith.constant 0 : index
      %59 = vector.load %arg18[%c0_53, %c0_54] : memref<16x8xf32, #tpu.memory_space<vmem>>, vector<16x8xf32>
      tpu.vector_store %arg18[%c0_53, %c0_54], %58 {strides = array<i32>} : memref<16x8xf32, #tpu.memory_space<vmem>>, vector<16x8xf32>,
      %cst_55 = arith.constant 0.000000e+00 : f32
      %60 = vector.broadcast %cst_55 : f32 to vector<16x1xf32>
      %c0_56 = arith.constant 0 : index
      %c0_57 = arith.constant 0 : index
      %61 = vector.load %arg19[%c0_56, %c0_57] : memref<16x1xf32, #tpu.memory_space<vmem>>, vector<16x1xf32>
      tpu.vector_store %arg19[%c0_56, %c0_57], %60 {strides = array<i32>} : memref<16x1xf32, #tpu.memory_space<vmem>>, vector<16x1xf32>,
    } else {
    }
    %c0 = arith.constant 0 : index
    %c0_1 = arith.constant 0 : index
    %3 = vector.load %arg2[%c0, %c0_1] : memref<128x16xf32, #tpu.memory_space<vmem>>, vector<128x16xf32>
    %c0_2 = arith.constant 0 : index
    %c0_3 = arith.constant 0 : index
    %4 = vector.load %arg1[%c0_2, %c0_3] : memref<16x8xf32, #tpu.memory_space<vmem>>, vector<16x8xf32>
    %cst = arith.constant dense<0.000000e+00> : vector<128x8xf32>
    %5 = tpu.matmul %3, %4, %cst {dimension_numbers = #tpu.dot_dimension_numbers<[1], [0], [0], [1], [0, 0, 1, 1], [], []>} : vector<128x16xf32>, vector<16x8xf32>, vector<128x8xf32> -> vector<128x8xf32>
    %c0_4 = arith.constant 0 : index
    %c0_5 = arith.constant 0 : index
    %6 = vector.load %arg16[%c0_4, %c0_5] : memref<8x1xf32, #tpu.memory_space<vmem>>, vector<8x1xf32>
    %cst_6 = arith.constant dense<0.000000e+00> : vector<128x1xf32>
    %7 = tpu.matmul %5, %6, %cst_6 {dimension_numbers = #tpu.dot_dimension_numbers<[1], [0], [0], [1], [0, 0, 1, 1], [], []>} : vector<128x8xf32>, vector<8x1xf32>, vector<128x1xf32> -> vector<128x1xf32>
    %c0_7 = arith.constant 0 : index
    %c0_8 = arith.constant 0 : index
    %8 = vector.load %arg3[%c0_7, %c0_8] : memref<128x16xf32, #tpu.memory_space<vmem>>, vector<128x16xf32>
    %c0_9 = arith.constant 0 : index
    %c0_10 = arith.constant 0 : index
    %9 = vector.load %arg17[%c0_9, %c0_10] : memref<16x1xf32, #tpu.memory_space<vmem>>, vector<16x1xf32>
    %cst_11 = arith.constant dense<0.000000e+00> : vector<128x1xf32>
    %10 = tpu.matmul %8, %9, %cst_11 {dimension_numbers = #tpu.dot_dimension_numbers<[1], [0], [0], [1], [0, 0, 1, 1], [], []>} : vector<128x16xf32>, vector<16x1xf32>, vector<128x1xf32> -> vector<128x1xf32>
    %11 = arith.addf %7, %10 : vector<128x1xf32>
    %cst_12 = arith.constant 0.000000e+00 : f32
    %12 = vector.broadcast %cst_12 : f32 to vector<128x1xf32>
    %13 = arith.cmpf ogt, %11, %12 : vector<128x1xf32>
    %cst_13 = arith.constant 2.000000e-01 : f32
    %14 = vector.broadcast %cst_13 : f32 to vector<128x1xf32>
    %15 = arith.mulf %14, %11 : vector<128x1xf32>
    %16 = arith.select %13, %11, %15 : vector<128x1xi1>, vector<128x1xf32>
    %cst_14 = arith.constant 0.000000e+00 : f32
    %17 = vector.broadcast %cst_14 : f32 to vector<128x1xf32>
    %18 = arith.subf %17, %16 : vector<128x1xf32>
    %19 = math.exp %18 : vector<128x1xf32>
    %cst_15 = arith.constant 1.000000e+00 : f32
    %20 = vector.broadcast %cst_15 : f32 to vector<128x1xf32>
    %21 = arith.addf %20, %19 : vector<128x1xf32>
    %cst_16 = arith.constant 1.000000e+00 : f32
    %22 = vector.broadcast %cst_16 : f32 to vector<128x1xf32>
    %23 = arith.divf %22, %21 : vector<128x1xf32>
    %c0_17 = arith.constant 0 : index
    %c0_18 = arith.constant 0 : index
    %24 = vector.load %arg15[%c0_17, %c0_18] : memref<128x1xf32, #tpu.memory_space<vmem>>, vector<128x1xf32>
    tpu.vector_store %arg15[%c0_17, %c0_18], %23 {strides = array<i32>} : memref<128x1xf32, #tpu.memory_space<vmem>>, vector<128x1xf32>,
    %c0_19 = arith.constant 0 : index
    %c0_20 = arith.constant 0 : index
    %25 = vector.load %arg18[%c0_19, %c0_20] : memref<16x8xf32, #tpu.memory_space<vmem>>, vector<16x8xf32>
    %c0_21 = arith.constant 0 : index
    %c0_22 = arith.constant 0 : index
    %26 = vector.load %arg4[%c0_21, %c0_22] : memref<16x128xf32, #tpu.memory_space<vmem>>, vector<16x128xf32>
    %27 = vector.broadcast %23 : vector<128x1xf32> to vector<128x8xf32>
    %28 = arith.mulf %5, %27 : vector<128x8xf32>
    %cst_23 = arith.constant dense<0.000000e+00> : vector<16x8xf32>
    %29 = tpu.matmul %26, %28, %cst_23 {dimension_numbers = #tpu.dot_dimension_numbers<[1], [0], [0], [1], [0, 0, 1, 1], [], []>} : vector<16x128xf32>, vector<128x8xf32>, vector<16x8xf32> -> vector<16x8xf32>
    %30 = arith.addf %25, %29 : vector<16x8xf32>
    %c0_24 = arith.constant 0 : index
    %c0_25 = arith.constant 0 : index
    %31 = vector.load %arg18[%c0_24, %c0_25] : memref<16x8xf32, #tpu.memory_space<vmem>>, vector<16x8xf32>
    tpu.vector_store %arg18[%c0_24, %c0_25], %30 {strides = array<i32>} : memref<16x8xf32, #tpu.memory_space<vmem>>, vector<16x8xf32>,
    %c0_26 = arith.constant 0 : index
    %c0_27 = arith.constant 0 : index
    %32 = vector.load %arg19[%c0_26, %c0_27] : memref<16x1xf32, #tpu.memory_space<vmem>>, vector<16x1xf32>
    %c0_28 = arith.constant 0 : index
    %c0_29 = arith.constant 0 : index
    %33 = vector.load %arg4[%c0_28, %c0_29] : memref<16x128xf32, #tpu.memory_space<vmem>>, vector<16x128xf32>
    %cst_30 = arith.constant 1.000000e+00 : f32
    %34 = vector.broadcast %cst_30 : f32 to vector<128x1xf32>
    %35 = arith.subf %34, %23 : vector<128x1xf32>
    %cst_31 = arith.constant dense<0.000000e+00> : vector<16x1xf32>
    %36 = tpu.matmul %33, %35, %cst_31 {dimension_numbers = #tpu.dot_dimension_numbers<[1], [0], [0], [1], [0, 0, 1, 1], [], []>} : vector<16x128xf32>, vector<128x1xf32>, vector<16x1xf32> -> vector<16x1xf32>
    %37 = arith.addf %32, %36 : vector<16x1xf32>
    %c0_32 = arith.constant 0 : index
    %c0_33 = arith.constant 0 : index
    %38 = vector.load %arg19[%c0_32, %c0_33] : memref<16x1xf32, #tpu.memory_space<vmem>>, vector<16x1xf32>
    tpu.vector_store %arg19[%c0_32, %c0_33], %37 {strides = array<i32>} : memref<16x1xf32, #tpu.memory_space<vmem>>, vector<16x1xf32>,
    %c1_i32 = arith.constant 1 : i32
    %39 = arith.cmpi eq, %arg0, %c1_i32 : i32
    %40 = arith.extui %39 : i1 to i32
    %c0_i32_34 = arith.constant 0 : i32
    %41 = arith.cmpi ne, %40, %c0_i32_34 : i32
    scf.if %41 {
      %c0_35 = arith.constant 0 : index
      %c0_36 = arith.constant 0 : index
      %42 = vector.load %arg1[%c0_35, %c0_36] : memref<16x8xf32, #tpu.memory_space<vmem>>, vector<16x8xf32>
      %c0_37 = arith.constant 0 : index
      %c0_38 = arith.constant 0 : index
      %43 = vector.load %arg5[%c0_37, %c0_38] : memref<16x1xf32, #tpu.memory_space<vmem>>, vector<16x1xf32>
      %c0_39 = arith.constant 0 : index
      %c0_40 = arith.constant 0 : index
      %44 = vector.load %arg18[%c0_39, %c0_40] : memref<16x8xf32, #tpu.memory_space<vmem>>, vector<16x8xf32>
      %45 = vector.broadcast %43 : vector<16x1xf32> to vector<16x8xf32>
      %46 = arith.mulf %44, %45 : vector<16x8xf32>
      %c0_41 = arith.constant 0 : index
      %c0_42 = arith.constant 0 : index
      %47 = vector.load %arg19[%c0_41, %c0_42] : memref<16x1xf32, #tpu.memory_space<vmem>>, vector<16x1xf32>
      %48 = arith.mulf %47, %43 : vector<16x1xf32>
      %49 = vector.broadcast %48 : vector<16x1xf32> to vector<16x8xf32>
      %50 = arith.mulf %49, %42 : vector<16x8xf32>
      %c0_43 = arith.constant 0 : index
      %c0_44 = arith.constant 0 : index
      %51 = vector.load %arg9[%c0_43, %c0_44] : memref<8x16xf32, #tpu.memory_space<vmem>>, vector<8x16xf32>
      %cst_45 = arith.constant dense<0.000000e+00> : vector<16x16xf32>
      %52 = tpu.matmul %46, %51, %cst_45 {dimension_numbers = #tpu.dot_dimension_numbers<[1], [0], [0], [1], [0, 0, 1, 1], [], []>} : vector<16x8xf32>, vector<8x16xf32>, vector<16x16xf32> -> vector<16x16xf32>
      %c0_46 = arith.constant 0 : index
      %c0_47 = arith.constant 0 : index
      %53 = vector.load %arg10[%c0_46, %c0_47] : memref<1x16xf32, #tpu.memory_space<vmem>>, vector<1x16xf32>
      %54 = vector.broadcast %53 : vector<1x16xf32> to vector<16x16xf32>
      %55 = arith.addf %52, %54 : vector<16x16xf32>
      %c0_48 = arith.constant 0 : index
      %c0_49 = arith.constant 0 : index
      %56 = vector.load %arg11[%c0_48, %c0_49] : memref<8x16xf32, #tpu.memory_space<vmem>>, vector<8x16xf32>
      %cst_50 = arith.constant dense<0.000000e+00> : vector<16x16xf32>
      %57 = tpu.matmul %50, %56, %cst_50 {dimension_numbers = #tpu.dot_dimension_numbers<[1], [0], [0], [1], [0, 0, 1, 1], [], []>} : vector<16x8xf32>, vector<8x16xf32>, vector<16x16xf32> -> vector<16x16xf32>
      %c0_51 = arith.constant 0 : index
      %c0_52 = arith.constant 0 : index
      %58 = vector.load %arg12[%c0_51, %c0_52] : memref<1x16xf32, #tpu.memory_space<vmem>>, vector<1x16xf32>
      %59 = vector.broadcast %58 : vector<1x16xf32> to vector<16x16xf32>
      %60 = arith.addf %57, %59 : vector<16x16xf32>
      %61 = tpu.concatenate %55, %60 in 1 : vector<16x16xf32>, vector<16x16xf32> -> vector<16x32xf32>
      %c0_53 = arith.constant 0 : index
      %c0_54 = arith.constant 0 : index
      %62 = vector.load %arg13[%c0_53, %c0_54] : memref<8x32xf32, #tpu.memory_space<vmem>>, vector<8x32xf32>
      %cst_55 = arith.constant dense<0.000000e+00> : vector<16x32xf32>
      %63 = tpu.matmul %42, %62, %cst_55 {dimension_numbers = #tpu.dot_dimension_numbers<[1], [0], [0], [1], [0, 0, 1, 1], [], []>} : vector<16x8xf32>, vector<8x32xf32>, vector<16x32xf32> -> vector<16x32xf32>
      %64 = arith.addf %61, %63 : vector<16x32xf32>
      %cst_56 = arith.constant 0.000000e+00 : f32
      %65 = vector.broadcast %cst_56 : f32 to vector<16x32xf32>
      %66 = arith.maximumf %64, %65 : vector<16x32xf32>
      %c0_57 = arith.constant 0 : index
      %c0_58 = arith.constant 0 : index
      %67 = vector.load %arg14[%c0_57, %c0_58] : memref<16x32xf32, #tpu.memory_space<vmem>>, vector<16x32xf32>
      tpu.vector_store %arg14[%c0_57, %c0_58], %66 {strides = array<i32>} : memref<16x32xf32, #tpu.memory_space<vmem>>, vector<16x32xf32>,
    } else {
    }
    return
  }
  func.func @transform_0(%arg0: i32) -> (i32, i32) {
    %c0_i32 = arith.constant 0 : i32
    %c0_i32_0 = arith.constant 0 : i32
    %c0_i32_1 = arith.constant 0 : i32
    return %c0_i32, %c0_i32_0 : i32, i32
  }
  func.func @transform_1(%arg0: i32) -> (i32, i32) {
    %c0_i32 = arith.constant 0 : i32
    %c0_i32_0 = arith.constant 0 : i32
    return %arg0, %c0_i32 : i32, i32
  }
  func.func @transform_2(%arg0: i32) -> (i32, i32) {
    %c0_i32 = arith.constant 0 : i32
    %c0_i32_0 = arith.constant 0 : i32
    return %arg0, %c0_i32 : i32, i32
  }
  func.func @transform_3(%arg0: i32) -> (i32, i32) {
    %c0_i32 = arith.constant 0 : i32
    %c0_i32_0 = arith.constant 0 : i32
    return %c0_i32, %arg0 : i32, i32
  }
  func.func @transform_4(%arg0: i32) -> (i32, i32) {
    %c0_i32 = arith.constant 0 : i32
    %c0_i32_0 = arith.constant 0 : i32
    %c0_i32_1 = arith.constant 0 : i32
    return %c0_i32, %c0_i32_0 : i32, i32
  }
  func.func @transform_5(%arg0: i32) -> (i32, i32) {
    %c0_i32 = arith.constant 0 : i32
    %c0_i32_0 = arith.constant 0 : i32
    %c0_i32_1 = arith.constant 0 : i32
    return %c0_i32, %c0_i32_0 : i32, i32
  }
  func.func @transform_6(%arg0: i32) -> (i32, i32) {
    %c0_i32 = arith.constant 0 : i32
    %c0_i32_0 = arith.constant 0 : i32
    %c0_i32_1 = arith.constant 0 : i32
    return %c0_i32, %c0_i32_0 : i32, i32
  }
  func.func @transform_7(%arg0: i32) -> (i32, i32) {
    %c0_i32 = arith.constant 0 : i32
    %c0_i32_0 = arith.constant 0 : i32
    %c0_i32_1 = arith.constant 0 : i32
    return %c0_i32, %c0_i32_0 : i32, i32
  }
  func.func @transform_8(%arg0: i32) -> (i32, i32) {
    %c0_i32 = arith.constant 0 : i32
    %c0_i32_0 = arith.constant 0 : i32
    %c0_i32_1 = arith.constant 0 : i32
    return %c0_i32, %c0_i32_0 : i32, i32
  }
  func.func @transform_9(%arg0: i32) -> (i32, i32) {
    %c0_i32 = arith.constant 0 : i32
    %c0_i32_0 = arith.constant 0 : i32
    %c0_i32_1 = arith.constant 0 : i32
    return %c0_i32, %c0_i32_0 : i32, i32
  }
  func.func @transform_10(%arg0: i32) -> (i32, i32) {
    %c0_i32 = arith.constant 0 : i32
    %c0_i32_0 = arith.constant 0 : i32
    %c0_i32_1 = arith.constant 0 : i32
    return %c0_i32, %c0_i32_0 : i32, i32
  }
  func.func @transform_11(%arg0: i32) -> (i32, i32) {
    %c0_i32 = arith.constant 0 : i32
    %c0_i32_0 = arith.constant 0 : i32
    %c0_i32_1 = arith.constant 0 : i32
    return %c0_i32, %c0_i32_0 : i32, i32
  }
  func.func @transform_12(%arg0: i32) -> (i32, i32) {
    %c0_i32 = arith.constant 0 : i32
    %c0_i32_0 = arith.constant 0 : i32
    %c0_i32_1 = arith.constant 0 : i32
    return %c0_i32, %c0_i32_0 : i32, i32
  }
  func.func @transform_13(%arg0: i32) -> (i32, i32) {
    %c0_i32 = arith.constant 0 : i32
    %c0_i32_0 = arith.constant 0 : i32
    %c0_i32_1 = arith.constant 0 : i32
    return %c0_i32, %c0_i32_0 : i32, i32
  }
  func.func @transform_14(%arg0: i32) -> (i32, i32) {
    %c0_i32 = arith.constant 0 : i32
    %c0_i32_0 = arith.constant 0 : i32
    return %arg0, %c0_i32 : i32, i32
  }
}

</mosaic_0001>

<bundles_post_ra>
// kernel: tpu_custom_call.1
= control target key start
LH: loop header
LB: loop body
LE: loop exit
PB: predicated region body
PF: predicated region fallthrough
CT: control target
= control target key end

     0   :  { %s3203_s0 = inlined_call_operand.vmem [shape: f32[16,8], index: 0, kind: input, shape index: {}]   ;;  %s3204_s1 = inlined_call_operand.vmem [shape: f32[256,16], index: 1, kind: input, shape index: {}]   ;;  %s3205_s2 = inlined_call_operand.vmem [shape: f32[256,16], index: 2, kind: input, shape index: {}]   ;;  %s3206_s3 = inlined_call_operand.vmem [shape: f32[16,256], index: 3, kind: input, shape index: {}]   ;;  %s3207_s4 = inlined_call_operand.vmem [shape: f32[16,1], index: 4, kind: input, shape index: {}]   ;;  %s3208_s5 = inlined_call_operand.vmem [shape: f32[8,32], index: 5, kind: input, shape index: {}]   ;;  %s3209_s6 = inlined_call_operand.vmem [shape: f32[1,32], index: 6, kind: input, shape index: {}]   ;;  %s3210_s7 = inlined_call_operand.vmem [shape: f32[1,32], index: 7, kind: input, shape index: {}]   ;;  %s3211_s8 = inlined_call_operand.vmem [shape: f32[8,16], index: 8, kind: input, shape index: {}]   ;;  %s3212_s9 = inlined_call_operand.vmem [shape: f32[1,16], index: 9, kind: input, shape index: {}]   ;;  %s3213_s10 = inlined_call_operand.vmem [shape: f32[8,16], index: 10, kind: input, shape index: {}]   ;;  %s3214_s11 = inlined_call_operand.vmem [shape: f32[1,16], index: 11, kind: input, shape index: {}]   ;;  %s3215_s12 = inlined_call_operand.vmem [shape: f32[8,32], index: 12, kind: input, shape index: {}]   ;;  %s3216_s13 = inlined_call_operand.hbm [shape: f32[16,32], index: 13, kind: output, shape index: {0}]   ;;  %s3217_s14 = inlined_call_operand.vmem [shape: f32[256,1], index: 14, kind: output, shape index: {1}]  }
   0x1   :  { %3218 = sst [smem:[#allocation11_spill]] %s3206_s3 }
   0x2   :  { %20 = vsyncpa [#allocation8], 0  ;;  %s2837_s29 = smov 0   ;;  %s2839_s30 = smov 0  }
   0x3   :  { %s2841_s15 = smov 0  }
   0x4 LB: > { %s2850_s16 = sadd.s32 4294967295, %s2753_s15   ;;  %s2852_s17 = sadd.s32 1, %s2753_s15   ;;  %s2753_s15 = sphi %s2841_s15, %s3224_s15   ;;  %s2749_s30 = sphi %s2839_s30, %s3223_s30   ;;  %s2745_s29 = sphi %s2837_s29, %s3222_s29  }
   0x5   : > { %s103_s18 = ssub.s32 %s2753_s15, %s2852_s17  ;;  %s106_s19 = sadd.s32 1, %s2749_s30 }
   0x6   : > { %p104_p0 = scmp.eq.s32.totalorder %s103_s18, 0  ;;  %p113_p1 = scmp.ne.s32.totalorder %s2749_s30, %s2745_s29 }
   0x7   : > { %p114_p2 = scmp.eq.s32.totalorder %s2753_s15, 0  ;;  %p2158_p4 = scmp.ge.s32.totalorder %s2753_s15, 2 }
   0x8   : > { %s2859_s20 = scalar_select %p104_p0, %s2749_s30, %s106_s19  }
   0x9   : > { %p115_p3 = por %p114_p2, %p113_p1  ;;  %405 = sbr.rel (%p2158_p4) target bundleno = 27 (0x1b), region = 56 }
   0xa   : > { %3219 = sst [smem:[#allocation10_spill]] %s2859_s20 }
  0x10   : > { %426 = sbr.rel (!%p115_p3) target bundleno = 27 (0x1b), region = 68  ;;  %s428_s21 = sand.u32 (%p115_p3), 1, %s2749_s30  }
  0x11   : > { %s2160_s22 = sshll.u32 (%p115_p3), %s2753_s15, 3  ;;  %s2159_s23 = sshll.u32 (%p115_p3), %s428_s21, 4 }
  0x12   : > { %s3220_s3 = sld [smem:[#allocation11_spill]] (%p115_p3)  ;;  %s430_s27 = scalar_lea.vmem (%p115_p3), [#allocation6], %s2159_s23 }
  0x18   : > { %s432_s26 = scalar_lea.vmem %s3220_s3, %s2160_s22 }
  0x19   : > { %v462_v0 = vld [vmem:[%s432_s26] sm:$0xff]  ;;  %v464_v1 = vld [vmem:[%s432_s26 + $0x10] sm:$0xff] }
  0x1a   : > { %463 = vst [vmem:[%s430_s27] sm:$0xff] %v462_v0  ;;  %465 = vst [vmem:[%s430_s27 + $0x8] sm:$0xff] %v464_v1 }
  0x1b PF: > { %p2161_p5 = scmp.ge.s32.totalorder %s2753_s15, 1  ;;  %p470_p6 = scmp.lt.s32.totalorder %s2753_s15, 3 }
  0x1d   : > { %p471_p7 = pnand %p2161_p5, %p470_p6 }
  0x1e   : > { %s477_s28 = sand.u32 (!%p471_p7), 1, %s2745_s29   ;;  %s2163_s18 = sshll.u32 (!%p471_p7), %s2850_s16, 4 }
  0x1f   : > { %474 = sbr.rel (%p471_p7) target bundleno = 1788 (0x6fc), region = 106  ;;  %s2867_s19 = sshll.u32 (!%p471_p7), %s477_s28, 4 }
  0x20   : > { %p533_p8 = scmp.lt.s32.totalorder (!%p471_p7), %s2163_s18, 31  ;;  %s479_s28 = scalar_lea.vmem (!%p471_p7), [#allocation6], %s2867_s19 }
  0x21   : > { %p2169_p9 = scmp.ne.s32.totalorder (!%p471_p7), %s2850_s16, 0 }
  0x26   : > { %s3226_s18 = smov (!%p533_p8, %s2163_s18), 31  ;;  %553 = sbr.rel (%p2169_p9) target bundleno = 402 (0x192), region = 114 }
  0x27   : > { %s2164_s21 = sshll.u32 %s3226_s18, 3  ;;  %vm563_vm0 = vcmask (!%p2169_p9), 261120   ;;  %v569_v2 = vld [vmem:[%s3208_s5] sm:$0xff] (!%p2169_p9)  ;;  %vm583_vm1 = vcmask (!%p2169_p9), 64512   ;;  %v2755_v7 = vmov (!%p2169_p9), 0.0   ;;  %vm567_vm2 = vcmask (!%p2169_p9), 7168  }
  0x28   : > { %s2872_s24 = scalar_lea.vmem %s3204_s1, %s2164_s21  ;;  %s2877_s15 = scalar_lea.vmem %s3205_s2, %s2164_s21  ;;  %v2171_v3 = vld [vmem:[%s3210_s7] ss:$0 sm:$0xff] (!%p2169_p9)  ;;  %667 = vst.msk [vmem:[#allocation4] sm:$0xff] (!%p2169_p9), %vm583_vm1, %v2755_v7  ;;  %668 = vst.msk [vmem:[#allocation4 + $0x8] sm:$0xff] (!%p2169_p9), %vm583_vm1, %v2755_v7  ;;  %v582_v12 = vld [vmem:[%s3203_s0 + $0x8] sm:$0xff] (!%p2169_p9) }
  0x29   : > { %s2882_s29 = scalar_lea.vmem %s3217_s14, %s2164_s21  ;;  %v577_v4 = vmul.f32 (!%p2169_p9), %v2171_v3, %v569_v2  ;;  %v581_v6 = vld [vmem:[%s3203_s0] sm:$0xff] (!%p2169_p9)  ;;  %669 = vst.msk [vmem:[#allocation5] sm:$0xff] (!%p2169_p9), %vm567_vm2, %v2755_v7  ;;  %670 = vst.msk [vmem:[#allocation5 + $0x8] sm:$0xff] (!%p2169_p9), %vm567_vm2, %v2755_v7 }
  0x2a   : > { %2338 = vmatprep.mubr.msk.f32.mxu0 (!%p2169_p9), %vm583_vm1, %v581_v6  ;;  %v2170_v8 = vld [vmem:[%s3209_s6] ss:$0 sm:$0xff] (!%p2169_p9) }
  0x2b   : > { %v578_v5 = vsel (!%p2169_p9), %vm563_vm0, %v577_v4, 0.0  ;;  %v562_v9 = vmul.f32 (!%p2169_p9), %v2170_v8, %v569_v2 }
  0x2c   : > { %579 = vadd.xlane.f32.xlu0 (!%p2169_p9), %v578_v5 }
  0x2d   : > { %v564_v10 = vsel %vm563_vm0, %v562_v9, 0.0 }
  0x30   : > { %565 = vadd.xlane.f32.xlu0 %v564_v10 }
  0xb9   : > { %v580_v11 = vpop.xlane.xlu0 %579 }
  0xba   : > { %2336 = vmatprep.subr.mxu0 %v580_v11 }
  0xbb   : > { %2337 = vmatpush3.msra.mxu0 %v580_v11 }
  0xbc   : > { %2339 = vmatmul.mubr.msk.f32.vlgmr.msra.gmra.mrb[0].mxu0 %vm583_vm1, %v582_v12 }
  0xbd   : > { %v566_v13 = vpop.xlane.xlu0 %565 }
  0xbe   : > { %568 = vst.msk [vmem:[#allocation2] sm:$0xff] %vm567_vm2, %v566_v13 }
 0x18f   : > { %v2340_v14 = vpop.f32.mrb[0].mxu0 }
 0x190   : > { %666 = vst.msk [vmem:[#allocation3 + $0x8] sm:$0xff] %vm567_vm2, %v2340_v14  ;;  %v656_v15 = vpop.f32.mrb[1].mxu0 }
 0x191   : > { %665 = vst.msk [vmem:[#allocation3] sm:$0xff] %vm567_vm2, %v656_v15 }
 0x192 PF: > { %v687_v16 = vld [vmem:[%s3203_s0] sm:$0xff]  ;;  %v688_v17 = vld [vmem:[%s3203_s0 + $0x8] sm:$0xff]  ;;  %vm689_vm3 = vcmask 130048   ;;  %v673_v21 = vld [vmem:[%s2872_s24 + $0x10] sm:$0xff]  ;;  %vm1095_vm4 = vcmask 64512   ;;  %v2756_v7 = vmov 0  }
 0x193   : > { %v671_v18 = vld [vmem:[%s2872_s24] sm:$0xff]  ;;  %v2508_v19 = vpack.c.bf16 %v688_v17, %v687_v16  ;;  %v672_v20 = vld [vmem:[%s2872_s24 + $0x8] sm:$0xff]  ;;  %v674_v26 = vld [vmem:[%s2872_s24 + $0x18] sm:$0xff]  ;;  %2633 = vset.pattern.permute.xlu0 %v2756_v7  ;;  %2634 = vset.pattern.permute.xlu1 %v2756_v7  ;;  %vm1433_vm15 = vcmask 7168   ;;  %p2222_p10 = scmp.ne.s32.totalorder %s2850_s16, 1 }
 0x194   : > { %2345 = vmatprep.mubr.msk.f32.mxu0 %vm689_vm3, %v671_v18  ;;  %v884_v24 = vld [vmem:[%s2877_s15] sm:$0xff]  ;;  %v883_v27 = vld [vmem:[#allocation2] sm:$0xff]  ;;  %v885_v29 = vld [vmem:[%s2877_s15 + $0x8] sm:$0xff] }
 0x195   : > { %2509 = vmatprep.subr.bf16.mxu0 %v2508_v19  ;;  %2373 = vmatprep.mubr.msk.f32.mxu1 %vm689_vm3, %v884_v24  ;;  %v675_v28 = vld [vmem:[%s2872_s24 + $0x20] sm:$0xff]  ;;  %v886_v30 = vld [vmem:[%s2877_s15 + $0x10] sm:$0xff]  ;;  %v676_v31 = vld [vmem:[%s2872_s24 + $0x28] sm:$0xff] }
 0x196   : > { %2511 = vmatpush3.bf16.msra.mxu0 %v2508_v19  ;;  %v677_v32 = vld [vmem:[%s2872_s24 + $0x30] sm:$0xff]  ;;  %v887_v33 = vld [vmem:[%s2877_s15 + $0x18] sm:$0xff]  ;;  %v888_v34 = vld [vmem:[%s2877_s15 + $0x20] sm:$0xff] }
 0x197   : > { %v901_v23 = vld [vmem:[#allocation3 + $0x8] sm:$0xff]  ;;  %v678_v35 = vld [vmem:[%s2872_s24 + $0x38] sm:$0xff]  ;;  %v889_v37 = vld [vmem:[%s2877_s15 + $0x28] sm:$0xff] }
 0x198   : > { %v900_v22 = vld [vmem:[#allocation3] sm:$0xff]  ;;  %v679_v36 = vld [vmem:[%s2872_s24 + $0x40] sm:$0xff]  ;;  %v890_v38 = vld [vmem:[%s2877_s15 + $0x30] sm:$0xff] }
 0x199   : > { %2346 = vmatmul.mubr.msk.f32.vlgmr.msra.gmra.mrb[0].mxu0 %vm689_vm3, %v672_v20  ;;  %v2512_v25 = vpack.c.bf16 %v901_v23, %v900_v22  ;;  %v680_v39 = vld [vmem:[%s2872_s24 + $0x48] sm:$0xff]  ;;  %v681_v40 = vld [vmem:[%s2872_s24 + $0x50] sm:$0xff]  ;;  %v891_v41 = vld [vmem:[%s2877_s15 + $0x38] sm:$0xff] }
 0x19a   : > { %2348 = vmatprep.mubr.msk.f32.mxu0 %vm689_vm3, %v673_v21  ;;  %v892_v42 = vld [vmem:[%s2877_s15 + $0x40] sm:$0xff]  ;;  %v682_v43 = vld [vmem:[%s2872_s24 + $0x58] sm:$0xff]  ;;  %v893_v45 = vld [vmem:[%s2877_s15 + $0x48] sm:$0xff] }
 0x19b   : > { %2513 = vmatprep.subr.bf16.mxu1 %v2512_v25  ;;  %v683_v44 = vld [vmem:[%s2872_s24 + $0x60] sm:$0xff]  ;;  %v894_v46 = vld [vmem:[%s2877_s15 + $0x50] sm:$0xff]  ;;  %v684_v47 = vld [vmem:[%s2872_s24 + $0x68] sm:$0xff] }
 0x19c   : > { %2515 = vmatpush3.bf16.msra.mxu1 %v2512_v25  ;;  %v685_v48 = vld [vmem:[%s2872_s24 + $0x70] sm:$0xff]  ;;  %v895_v49 = vld [vmem:[%s2877_s15 + $0x58] sm:$0xff]  ;;  %v896_v50 = vld [vmem:[%s2877_s15 + $0x60] sm:$0xff] }
 0x19d   : > { %2349 = vmatmul.mubr.msk.f32.gmra.mrb[2].mxu0 %vm689_vm3, %v674_v26  ;;  %2397 = vmatprep.subr.mxu1 %v883_v27  ;;  %v686_v51 = vld [vmem:[%s2872_s24 + $0x78] sm:$0xff]  ;;  %v897_v52 = vld [vmem:[%s2877_s15 + $0x68] sm:$0xff]  ;;  %v898_v53 = vld [vmem:[%s2877_s15 + $0x70] sm:$0xff] }
 0x19e   : > { %2351 = vmatprep.mubr.msk.f32.mxu0 %vm689_vm3, %v675_v28  ;;  %v899_v54 = vld [vmem:[%s2877_s15 + $0x78] sm:$0xff]  ;;  %s2758_s15 = smov (!%p2222_p10), 16  }
 0x19f   : > { %2374 = vmatmul.mubr.msk.f32.vlgmr.msra.gmra.mrb[0].mxu1 %vm689_vm3, %v885_v29 }
 0x1a0   : > { %2398 = vmatpush3.msra.mxu1 %v883_v27  ;;  %2376 = vmatprep.mubr.msk.f32.mxu1 %vm689_vm3, %v886_v30 }
 0x1a1   : > { %2352 = vmatmul.mubr.msk.f32.gmra.mrb[4].mxu0 %vm689_vm3, %v676_v31 }
 0x1a2   : > { %2354 = vmatprep.mubr.msk.f32.mxu0 %vm689_vm3, %v677_v32 }
 0x1a3   : > { %2377 = vmatmul.mubr.msk.f32.gmra.mrb[2].mxu1 %vm689_vm3, %v887_v33 }
 0x1a4   : > { %2379 = vmatprep.mubr.msk.f32.mxu1 %vm689_vm3, %v888_v34 }
 0x1a5   : > { %2355 = vmatmul.mubr.msk.f32.gmra.mrb[6].mxu0 %vm689_vm3, %v678_v35 }
 0x1a6   : > { %2357 = vmatprep.mubr.msk.f32.mxu0 %vm689_vm3, %v679_v36 }
 0x1a7   : > { %2380 = vmatmul.mubr.msk.f32.gmra.mrb[4].mxu1 %vm689_vm3, %v889_v37 }
 0x1a8   : > { %2382 = vmatprep.mubr.msk.f32.mxu1 %vm689_vm3, %v890_v38 }
 0x1a9   : > { %2358 = vmatmul.mubr.msk.f32.gmra.mrb[8].mxu0 %vm689_vm3, %v680_v39 }
 0x1aa   : > { %2360 = vmatprep.mubr.msk.f32.mxu0 %vm689_vm3, %v681_v40 }
 0x1ab   : > { %2383 = vmatmul.mubr.msk.f32.gmra.mrb[6].mxu1 %vm689_vm3, %v891_v41 }
 0x1ac   : > { %2385 = vmatprep.mubr.msk.f32.mxu1 %vm689_vm3, %v892_v42 }
 0x1ad   : > { %2361 = vmatmul.mubr.msk.f32.gmra.mrb[10].mxu0 %vm689_vm3, %v682_v43 }
 0x1ae   : > { %2363 = vmatprep.mubr.msk.f32.mxu0 %vm689_vm3, %v683_v44 }
 0x1af   : > { %2386 = vmatmul.mubr.msk.f32.gmra.mrb[8].mxu1 %vm689_vm3, %v893_v45 }
 0x1b0   : > { %2388 = vmatprep.mubr.msk.f32.mxu1 %vm689_vm3, %v894_v46 }
 0x1b1   : > { %2364 = vmatmul.mubr.msk.f32.gmra.mrb[12].mxu0 %vm689_vm3, %v684_v47 }
 0x1b2   : > { %2366 = vmatprep.mubr.msk.f32.mxu0 %vm689_vm3, %v685_v48 }
 0x1b3   : > { %2389 = vmatmul.mubr.msk.f32.gmra.mrb[10].mxu1 %vm689_vm3, %v895_v49 }
 0x1b4   : > { %2391 = vmatprep.mubr.msk.f32.mxu1 %vm689_vm3, %v896_v50 }
 0x1b5   : > { %2367 = vmatmul.mubr.msk.f32.gmra.mrb[14].mxu0 %vm689_vm3, %v686_v51 }
 0x1b7   : > { %2392 = vmatmul.mubr.msk.f32.gmra.mrb[12].mxu1 %vm689_vm3, %v897_v52 }
 0x1b8   : > { %2394 = vmatprep.mubr.msk.f32.mxu1 %vm689_vm3, %v898_v53 }
 0x1bb   : > { %2395 = vmatmul.mubr.msk.f32.gmra.mrb[14].mxu1 %vm689_vm3, %v899_v54 }
 0x26c   : > { %v2982_v55 = vpop.f32.mrb[0].mxu0 }
 0x26d   : > { %v2984_v56 = vpop.f32.mrb[1].mxu0 }
 0x26e   : > { %2399 = vmatprep.mubr.msk.f32.mxu1 %vm1095_vm4, %v2984_v56 }
 0x26f   : > { %2400 = vmatmul.mubr.msk.f32.vlgmr.msra.gmra.mrb[0].mxu1 %vm1095_vm4, %v2982_v55 }
 0x270   : > { %v2990_v57 = vpop.f32.mrb[2].mxu0 }
 0x271   : > { %v2992_v58 = vpop.f32.mrb[3].mxu0 }
 0x272   : > { %2402 = vmatprep.mubr.msk.f32.mxu1 %vm1095_vm4, %v2992_v58 }
 0x273   : > { %2403 = vmatmul.mubr.msk.f32.gmra.mrb[2].mxu1 %vm1095_vm4, %v2990_v57 }
 0x274   : > { %v2998_v59 = vpop.f32.mrb[4].mxu0 }
 0x275   : > { %v3000_v60 = vpop.f32.mrb[5].mxu0 }
 0x276   : > { %2405 = vmatprep.mubr.msk.f32.mxu1 %vm1095_vm4, %v3000_v60 }
 0x277   : > { %2406 = vmatmul.mubr.msk.f32.gmra.mrb[4].mxu1 %vm1095_vm4, %v2998_v59 }
 0x278   : > { %v3006_v61 = vpop.f32.mrb[6].mxu0 }
 0x279   : > { %v3008_v62 = vpop.f32.mrb[7].mxu0 }
 0x27a   : > { %2408 = vmatprep.mubr.msk.f32.mxu1 %vm1095_vm4, %v3008_v62 }
 0x27b   : > { %2409 = vmatmul.mubr.msk.f32.gmra.mrb[6].mxu1 %vm1095_vm4, %v3006_v61 }
 0x27c   : > { %v3014_v63 = vpop.f32.mrb[8].mxu0 }
 0x27d   : > { %v3016_v0 = vpop.f32.mrb[9].mxu0 }
 0x27e   : > { %2411 = vmatprep.mubr.msk.f32.mxu1 %vm1095_vm4, %v3016_v0 }
 0x27f   : > { %2412 = vmatmul.mubr.msk.f32.gmra.mrb[8].mxu1 %vm1095_vm4, %v3014_v63 }
 0x280   : > { %v3022_v1 = vpop.f32.mrb[10].mxu0 }
 0x281   : > { %v3024_v2 = vpop.f32.mrb[11].mxu0 }
 0x282   : > { %2414 = vmatprep.mubr.msk.f32.mxu1 %vm1095_vm4, %v3024_v2 }
 0x283   : > { %2415 = vmatmul.mubr.msk.f32.gmra.mrb[10].mxu1 %vm1095_vm4, %v3022_v1 }
 0x284   : > { %v3030_v3 = vpop.f32.mrb[12].mxu0 }
 0x285   : > { %v3032_v4 = vpop.f32.mrb[13].mxu0 }
 0x286   : > { %2417 = vmatprep.mubr.msk.f32.mxu1 %vm1095_vm4, %v3032_v4 }
 0x287   : > { %2418 = vmatmul.mubr.msk.f32.gmra.mrb[12].mxu1 %vm1095_vm4, %v3030_v3 }
 0x288   : > { %v3038_v5 = vpop.f32.mrb[14].mxu0 }
 0x289   : > { %v3040_v6 = vpop.f32.mrb[15].mxu0 }
 0x28a   : > { %2420 = vmatprep.mubr.msk.f32.mxu1 %vm1095_vm4, %v3040_v6 }
 0x28b   : > { %2421 = vmatmul.mubr.msk.f32.gmra.mrb[14].mxu1 %vm1095_vm4, %v3038_v5 }
 0x342   : > { %v2401_v8 = vpop.f32.mrb[0].mxu1 }
 0x343   : > { %vm1290_vm5 = vcmp.gt.f32.partialorder %v2401_v8, 0.0  ;;  %v1306_v9 = vmul.f32 0.2, %v2401_v8  ;;  %v1210_v10 = vpop.f32.mrb[1].mxu1 }
 0x344   : > { %vm1289_vm6 = vcmp.gt.f32.partialorder %v1210_v10, 0.0  ;;  %v1305_v11 = vmul.f32 0.2, %v1210_v10 }
 0x345   : > { %v1322_v12 = vsel %vm1290_vm5, %v2401_v8, %v1306_v9 }
 0x346   : > { %v1338_v13 = vsub.f32 0.0, %v1322_v12  ;;  %v1321_v14 = vsel %vm1289_vm6, %v1210_v10, %v1305_v11  ;;  %v2404_v15 = vpop.f32.mrb[2].mxu1 }
 0x347   : > { %v1337_v16 = vsub.f32 0.0, %v1321_v14  ;;  %vm1292_vm7 = vcmp.gt.f32.partialorder %v2404_v15, 0.0  ;;  %v1308_v17 = vmul.f32 0.2, %v2404_v15  ;;  %v1220_v18 = vpop.f32.mrb[3].mxu1 }
 0x348   : > { %v1355_v19 = vmul.f32 1.442695, %v1338_v13  ;;  %vm1291_vm8 = vcmp.gt.f32.partialorder %v1220_v18, 0.0  ;;  %v1307_v20 = vmul.f32 0.2, %v1220_v18 }
 0x349   : > { %v1353_v21 = vmul.f32 1.442695, %v1337_v16  ;;  %v1324_v22 = vsel %vm1292_vm7, %v2404_v15, %v1308_v17 }
 0x34a   : > { %2635 = vpow2.f32 %v1355_v19  ;;  %v1340_v23 = vsub.f32 0.0, %v1324_v22  ;;  %v1323_v24 = vsel %vm1291_vm8, %v1220_v18, %v1307_v20  ;;  %v2407_v25 = vpop.f32.mrb[4].mxu1 }
 0x34b   : > { %2637 = vpow2.f32 %v1353_v21  ;;  %v1339_v26 = vsub.f32 0.0, %v1323_v24  ;;  %vm1294_vm9 = vcmp.gt.f32.partialorder %v2407_v25, 0.0  ;;  %v1310_v27 = vmul.f32 0.2, %v2407_v25  ;;  %v1230_v28 = vpop.f32.mrb[5].mxu1 }
 0x34c   : > { %v1359_v29 = vmul.f32 1.442695, %v1340_v23  ;;  %vm1293_vm10 = vcmp.gt.f32.partialorder %v1230_v28, 0.0  ;;  %v1309_v30 = vmul.f32 0.2, %v1230_v28 }
 0x34d   : > { %v1357_v31 = vmul.f32 1.442695, %v1339_v26  ;;  %v1326_v32 = vsel %vm1294_vm9, %v2407_v25, %v1310_v27 }
 0x34e   : > { %2639 = vpow2.f32 %v1359_v29  ;;  %v1342_v33 = vsub.f32 0.0, %v1326_v32  ;;  %v1325_v34 = vsel %vm1293_vm10, %v1230_v28, %v1309_v30  ;;  %v2410_v35 = vpop.f32.mrb[6].mxu1 }
 0x34f   : > { %2641 = vpow2.f32 %v1357_v31  ;;  %v1341_v36 = vsub.f32 0.0, %v1325_v34  ;;  %vm1296_vm11 = vcmp.gt.f32.partialorder %v2410_v35, 0.0  ;;  %v1312_v37 = vmul.f32 0.2, %v2410_v35  ;;  %v1240_v38 = vpop.f32.mrb[7].mxu1 }
 0x350   : > { %v1363_v39 = vmul.f32 1.442695, %v1342_v33  ;;  %vm1295_vm12 = vcmp.gt.f32.partialorder %v1240_v38, 0.0  ;;  %v1311_v40 = vmul.f32 0.2, %v1240_v38 }
 0x351   : > { %v1361_v41 = vmul.f32 1.442695, %v1341_v36  ;;  %v1328_v42 = vsel %vm1296_vm11, %v2410_v35, %v1312_v37 }
 0x352   : > { %2643 = vpow2.f32 %v1363_v39  ;;  %v1344_v43 = vsub.f32 0.0, %v1328_v42  ;;  %v1327_v44 = vsel %vm1295_vm12, %v1240_v38, %v1311_v40  ;;  %v2413_v45 = vpop.f32.mrb[8].mxu1 }
 0x353   : > { %2645 = vpow2.f32 %v1361_v41  ;;  %v1343_v46 = vsub.f32 0.0, %v1327_v44  ;;  %vm1298_vm13 = vcmp.gt.f32.partialorder %v2413_v45, 0.0  ;;  %v1314_v47 = vmul.f32 0.2, %v2413_v45  ;;  %v1250_v48 = vpop.f32.mrb[9].mxu1 }
 0x354   : > { %v2636_v49 = vpop.eup %2635  ;;  %v1367_v50 = vmul.f32 1.442695, %v1344_v43  ;;  %vm1297_vm14 = vcmp.gt.f32.partialorder %v1250_v48, 0.0  ;;  %v1313_v51 = vmul.f32 0.2, %v1250_v48 }
 0x355   : > { %v2638_v52 = vpop.eup %2637  ;;  %v1386_v53 = vadd.f32 1.0, %v2636_v49  ;;  %v1365_v54 = vmul.f32 1.442695, %v1343_v46  ;;  %v1330_v7 = vsel %vm1298_vm13, %v2413_v45, %v1314_v47 }
 0x356   : > { %v1385_v8 = vadd.f32 1.0, %v2638_v52  ;;  %2647 = vpow2.f32 %v1367_v50  ;;  %v1346_v9 = vsub.f32 0.0, %v1330_v7  ;;  %v1329_v10 = vsel %vm1297_vm14, %v1250_v48, %v1313_v51  ;;  %v2416_v11 = vpop.f32.mrb[10].mxu1 }
 0x357   : > { %2649 = vrcp.f32 %v1386_v53  ;;  %v1345_v12 = vsub.f32 0.0, %v1329_v10  ;;  %vm1300_vm0 = vcmp.gt.f32.partialorder %v2416_v11, 0.0  ;;  %v1316_v13 = vmul.f32 0.2, %v2416_v11  ;;  %v1260_v14 = vpop.f32.mrb[11].mxu1 }
 0x358   : > { %v2640_v15 = vpop.eup %2639  ;;  %2651 = vrcp.f32 %v1385_v8  ;;  %v1371_v16 = vmul.f32 1.442695, %v1346_v9  ;;  %vm1299_vm1 = vcmp.gt.f32.partialorder %v1260_v14, 0.0  ;;  %v1315_v17 = vmul.f32 0.2, %v1260_v14 }
 0x359   : > { %v2642_v18 = vpop.eup %2641  ;;  %v1388_v19 = vadd.f32 1.0, %v2640_v15  ;;  %2653 = vpow2.f32 %v1365_v54  ;;  %v1369_v20 = vmul.f32 1.442695, %v1345_v12  ;;  %v1332_v21 = vsel %vm1300_vm0, %v2416_v11, %v1316_v13 }
 0x35a   : > { %v1387_v22 = vadd.f32 1.0, %v2642_v18  ;;  %2655 = vpow2.f32 %v1371_v16  ;;  %v1348_v23 = vsub.f32 0.0, %v1332_v21  ;;  %v1331_v24 = vsel %vm1299_vm1, %v1260_v14, %v1315_v17  ;;  %v2419_v25 = vpop.f32.mrb[12].mxu1 }
 0x35b   : > { %2657 = vrcp.f32 %v1388_v19  ;;  %v1347_v26 = vsub.f32 0.0, %v1331_v24  ;;  %vm1302_vm2 = vcmp.gt.f32.partialorder %v2419_v25, 0.0  ;;  %v1318_v27 = vmul.f32 0.2, %v2419_v25  ;;  %v1270_v28 = vpop.f32.mrb[13].mxu1 }
 0x35c   : > { %v2644_v29 = vpop.eup %2643  ;;  %2659 = vrcp.f32 %v1387_v22  ;;  %v1375_v30 = vmul.f32 1.442695, %v1348_v23  ;;  %vm1301_vm5 = vcmp.gt.f32.partialorder %v1270_v28, 0.0  ;;  %v1317_v31 = vmul.f32 0.2, %v1270_v28 }
 0x35d   : > { %v2646_v32 = vpop.eup %2645  ;;  %v1390_v33 = vadd.f32 1.0, %v2644_v29  ;;  %2661 = vpow2.f32 %v1369_v20  ;;  %v1373_v34 = vmul.f32 1.442695, %v1347_v26  ;;  %v1334_v35 = vsel %vm1302_vm2, %v2419_v25, %v1318_v27 }
 0x35e   : > { %v1389_v36 = vadd.f32 1.0, %v2646_v32  ;;  %2663 = vpow2.f32 %v1375_v30  ;;  %v1350_v37 = vsub.f32 0.0, %v1334_v35  ;;  %v1333_v38 = vsel %vm1301_vm5, %v1270_v28, %v1317_v31  ;;  %v2422_v39 = vpop.f32.mrb[14].mxu1 }
 0x35f   : > { %2665 = vrcp.f32 %v1390_v33  ;;  %v1349_v40 = vsub.f32 0.0, %v1333_v38  ;;  %vm1304_vm6 = vcmp.gt.f32.partialorder %v2422_v39, 0.0  ;;  %v1320_v41 = vmul.f32 0.2, %v2422_v39  ;;  %v1280_v42 = vpop.f32.mrb[15].mxu1 }
 0x360   : > { %v2648_v43 = vpop.eup %2647  ;;  %2667 = vrcp.f32 %v1389_v36  ;;  %v1379_v44 = vmul.f32 1.442695, %v1350_v37  ;;  %vm1303_vm7 = vcmp.gt.f32.partialorder %v1280_v42, 0.0  ;;  %v1319_v45 = vmul.f32 0.2, %v1280_v42 }
 0x361   : > { %v2650_v46 = vpop.eup %2649  ;;  %v1392_v47 = vadd.f32 1.0, %v2648_v43  ;;  %2669 = vpow2.f32 %v1373_v34  ;;  %v1377_v48 = vmul.f32 1.442695, %v1349_v40  ;;  %v1336_v49 = vsel %vm1304_vm6, %v2422_v39, %v1320_v41 }
 0x362   : > { %v2652_v50 = vpop.eup %2651  ;;  %1435 = vst.msk [vmem:[%s2882_s29 + $0x8] sm:$0xff] %vm1433_vm15, %v2650_v46  ;;  %2671 = vpow2.f32 %v1379_v44  ;;  %v1352_v51 = vsub.f32 0.0, %v1336_v49  ;;  %v1335_v52 = vsel %vm1303_vm7, %v1280_v42, %v1319_v45  ;;  %v1634_v53 = vsub.f32 1.0, %v2650_v46 }
 0x363   : > { %v2654_v54 = vpop.eup %2653  ;;  %1434 = vst.msk [vmem:[%s2882_s29] sm:$0xff] %vm1433_vm15, %v2652_v50  ;;  %2673 = vrcp.f32 %v1392_v47  ;;  %v1351_v7 = vsub.f32 0.0, %v1335_v52  ;;  %1456 = vperm.xlu0 %2633, %v2652_v50   ;;  %v1633_v8 = vsub.f32 1.0, %v2652_v50 }
 0x364   : > { %v2656_v9 = vpop.eup %2655  ;;  %v1391_v10 = vadd.f32 1.0, %v2654_v54  ;;  %2675 = vpow2.f32 %v1377_v48  ;;  %v1383_v11 = vmul.f32 1.442695, %v1352_v51 }
 0x365   : > { %v2658_v12 = vpop.eup %2657  ;;  %v1394_v13 = vadd.f32 1.0, %v2656_v9  ;;  %v1381_v14 = vmul.f32 1.442695, %v1351_v7  ;;  %v3050_v15 = vpack.c.bf16 %v1634_v53, %v1633_v8 }
 0x366   : > { %v2660_v16 = vpop.eup %2659  ;;  %1437 = vst.msk [vmem:[%s2882_s29 + $0x18] sm:$0xff] %vm1433_vm15, %v2658_v12  ;;  %2677 = vrcp.f32 %v1391_v10  ;;  %1471 = vperm.xlu1 %2634, %v2658_v12   ;;  %v1636_v17 = vsub.f32 1.0, %v2658_v12 }
 0x367   : > { %v2662_v18 = vpop.eup %2661  ;;  %1436 = vst.msk [vmem:[%s2882_s29 + $0x10] sm:$0xff] %vm1433_vm15, %v2660_v16  ;;  %2679 = vrcp.f32 %v1394_v13  ;;  %1461 = vperm.xlu0 %2633, %v2650_v46   ;;  %v1635_v19 = vsub.f32 1.0, %v2660_v16 }
 0x368   : > { %v2664_v20 = vpop.eup %2663  ;;  %v1393_v21 = vadd.f32 1.0, %v2662_v18  ;;  %2681 = vpow2.f32 %v1383_v11 }
 0x369   : > { %v2666_v22 = vpop.eup %2665  ;;  %v1396_v23 = vadd.f32 1.0, %v2664_v20  ;;  %2683 = vpow2.f32 %v1381_v14  ;;  %v3056_v24 = vpack.c.bf16 %v1636_v17, %v1635_v19  ;;  %v1452_v17 = vld [vmem:[%s479_s28] sm:$0xff] }
 0x36a   : > { %v2668_v25 = vpop.eup %2667  ;;  %1439 = vst.msk [vmem:[%s2882_s29 + $0x28] sm:$0xff] %vm1433_vm15, %v2666_v22  ;;  %2685 = vrcp.f32 %v1393_v21  ;;  %1466 = vperm.xlu1 %2634, %v2660_v16   ;;  %v1638_v26 = vsub.f32 1.0, %v2666_v22  ;;  %2455 = vmatprep.mubr.f32.mxu0 %v1452_v17 }
 0x36b   : > { %v2670_v27 = vpop.eup %2669  ;;  %1438 = vst.msk [vmem:[%s2882_s29 + $0x20] sm:$0xff] %vm1433_vm15, %v2668_v25  ;;  %2687 = vrcp.f32 %v1396_v23  ;;  %1476 = vperm.xlu0 %2633, %v2668_v25   ;;  %v1637_v28 = vsub.f32 1.0, %v2668_v25 }
 0x36c   : > { %v2672_v29 = vpop.eup %2671  ;;  %v1395_v30 = vadd.f32 1.0, %v2670_v27 }
 0x36d   : > { %v2674_v31 = vpop.eup %2673  ;;  %v1398_v32 = vadd.f32 1.0, %v2672_v29  ;;  %v3062_v33 = vpack.c.bf16 %v1638_v26, %v1637_v28 }
 0x36e   : > { %v2676_v34 = vpop.eup %2675  ;;  %1441 = vst.msk [vmem:[%s2882_s29 + $0x38] sm:$0xff] %vm1433_vm15, %v2674_v31  ;;  %2689 = vrcp.f32 %v1395_v30  ;;  %1481 = vperm.xlu1 %2634, %v2666_v22   ;;  %v1640_v36 = vsub.f32 1.0, %v2674_v31 }
 0x36f   : > { %2691 = vrcp.f32 %v1398_v32  ;;  %v1397_v35 = vadd.f32 1.0, %v2676_v34 }
 0x370   : > { %v2678_v37 = vpop.eup %2677 }
 0x371   : > { %v2680_v38 = vpop.eup %2679  ;;  %1440 = vst.msk [vmem:[%s2882_s29 + $0x30] sm:$0xff] %vm1433_vm15, %v2678_v37  ;;  %2693 = vrcp.f32 %v1397_v35  ;;  %1486 = vperm.xlu0 %2633, %v2678_v37   ;;  %v1639_v39 = vsub.f32 1.0, %v2678_v37 }
 0x372   : > { %v2682_v40 = vpop.eup %2681  ;;  %1443 = vst.msk [vmem:[%s2882_s29 + $0x48] sm:$0xff] %vm1433_vm15, %v2680_v38  ;;  %1491 = vperm.xlu1 %2634, %v2674_v31   ;;  %v1642_v44 = vsub.f32 1.0, %v2680_v38 }
 0x373   : > { %v2684_v41 = vpop.eup %2683  ;;  %v1400_v42 = vadd.f32 1.0, %v2682_v40  ;;  %v3070_v43 = vpack.c.bf16 %v1640_v36, %v1639_v39 }
 0x374   : > { %v2686_v45 = vpop.eup %2685  ;;  %v1399_v46 = vadd.f32 1.0, %v2684_v41 }
 0x375   : > { %v2688_v47 = vpop.eup %2687  ;;  %1442 = vst.msk [vmem:[%s2882_s29 + $0x40] sm:$0xff] %vm1433_vm15, %v2686_v45  ;;  %2695 = vrcp.f32 %v1400_v42  ;;  %1496 = vperm.xlu0 %2633, %v2686_v45   ;;  %v1641_v48 = vsub.f32 1.0, %v2686_v45 }
 0x376   : > { %1445 = vst.msk [vmem:[%s2882_s29 + $0x58] sm:$0xff] %vm1433_vm15, %v2688_v47  ;;  %2697 = vrcp.f32 %v1399_v46  ;;  %1501 = vperm.xlu1 %2634, %v2680_v38   ;;  %v1644_v50 = vsub.f32 1.0, %v2688_v47 }
 0x377   : > { %v3076_v49 = vpack.c.bf16 %v1642_v44, %v1641_v48 }
 0x378   : > { %v2690_v51 = vpop.eup %2689 }
 0x379   : > { %v2692_v52 = vpop.eup %2691  ;;  %1444 = vst.msk [vmem:[%s2882_s29 + $0x50] sm:$0xff] %vm1433_vm15, %v2690_v51  ;;  %1506 = vperm.xlu0 %2633, %v2690_v51   ;;  %v1643_v53 = vsub.f32 1.0, %v2690_v51 }
 0x37a   : > { %1447 = vst.msk [vmem:[%s2882_s29 + $0x68] sm:$0xff] %vm1433_vm15, %v2692_v52  ;;  %1511 = vperm.xlu1 %2634, %v2688_v47   ;;  %v1646_v54 = vsub.f32 1.0, %v2692_v52 }
 0x37b   : > { %v2694_v7 = vpop.eup %2693  ;;  %v3082_v8 = vpack.c.bf16 %v1644_v50, %v1643_v53  ;;  %v1453_v50 = vld [vmem:[%s479_s28 + $0x8] sm:$0xff] }
 0x37c   : > { %1446 = vst.msk [vmem:[%s2882_s29 + $0x60] sm:$0xff] %vm1433_vm15, %v2694_v7  ;;  %v1645_v9 = vsub.f32 1.0, %v2694_v7 }
 0x37d   : > { %1516 = vperm.xlu0 %2633, %v2694_v7  }
 0x37e   : > { %1521 = vperm.xlu1 %2634, %v2692_v52   ;;  %v3086_v10 = vpack.c.bf16 %v1646_v54, %v1645_v9  ;;  %v1734_v54 = vld [vmem:[%s3207_s4] sm:$0xff] (!%p2222_p10)  ;;  %v2757_v9 = vmov (!%p2222_p10), 0  }
 0x37f   : > { %v2696_v11 = vpop.eup %2695 }
 0x380   : > { %v2698_v12 = vpop.eup %2697  ;;  %1449 = vst.msk [vmem:[%s2882_s29 + $0x78] sm:$0xff] %vm1433_vm15, %v2696_v11  ;;  %v1648_v13 = vsub.f32 1.0, %v2696_v11 }
 0x381   : > { %1448 = vst.msk [vmem:[%s2882_s29 + $0x70] sm:$0xff] %vm1433_vm15, %v2698_v12  ;;  %1526 = vperm.xlu0 %2633, %v2698_v12   ;;  %v1647_v14 = vsub.f32 1.0, %v2698_v12 }
 0x382   : > { %1531 = vperm.xlu1 %2634, %v2696_v11  }
 0x383   : > { %v3092_v16 = vpack.c.bf16 %v1648_v13, %v1647_v14  ;;  %v1855_v13 = vld [vmem:[%s3213_s10] sm:$0xff] (!%p2222_p10) }
 0x384   : > { %2498 = vmatprep.subr.mxu1 (!%p2222_p10), %v1855_v13  ;;  %v1766_v14 = vld [vmem:[%s3211_s8] sm:$0xff] (!%p2222_p10) }
 0x385   : > { %2699 = vset.pattern.permute.xlu0 (!%p2222_p10), %v2757_v9  ;;  %2499 = vmatpush3.msra.mxu1 (!%p2222_p10), %v1855_v13 }
 0x386   : > { %2700 = vset.pattern.permute.xlu1 (!%p2222_p10), %v2757_v9 }
 0x387   : > { %1740 = vperm.xlu1 (!%p2222_p10), %2700, %v1734_v54  }
 0x3e2   : > { %v1457_v18 = vpop.permute.xlu0 %1456 }
 0x3e3   : > { %v1534_v21 = vmul.f32 %v1457_v18, %v2984_v56  ;;  %v1732_v18 = vld [vmem:[%s3203_s0] sm:$0xff] (!%p2222_p10) }
 0x3e5   : > { %v1472_v19 = vpop.permute.xlu1 %1471 }
 0x3e6   : > { %v1462_v20 = vpop.permute.xlu0 %1461  ;;  %v1537_v26 = vmul.f32 %v2990_v57, %v1472_v19 }
 0x3e7   : > { %v1535_v22 = vmul.f32 %v2982_v55, %v1462_v20 }
 0x3e9   : > { %v2516_v23 = vpack.c.bf16 %v1535_v22, %v1534_v21  ;;  %v1467_v25 = vpop.permute.xlu1 %1466 }
 0x3ea   : > { %v1536_v27 = vmul.f32 %v1467_v25, %v2992_v58  ;;  %v1477_v28 = vpop.permute.xlu0 %1476  ;;  %v1733_v25 = vld [vmem:[%s3203_s0 + $0x8] sm:$0xff] (!%p2222_p10) }
 0x3eb   : > { %2517 = vmatprep.subr.bf16.mxu0 %v2516_v23  ;;  %v1538_v31 = vmul.f32 %v1477_v28, %v3000_v60 }
 0x3ec   : > { %v2520_v29 = vpack.c.bf16 %v1537_v26, %v1536_v27  ;;  %2519 = vmatpush3.bf16.msra.mxu0 %v2516_v23 }
 0x3ed   : > { %v1482_v30 = vpop.permute.xlu1 %1481 }
 0x3ee   : > { %v1539_v32 = vmul.f32 %v2998_v59, %v1482_v30  ;;  %2521 = vmatprep.subr.bf16.mxu0 %v2520_v29  ;;  %v2226_v30 = vld [vmem:[%s3214_s11] ss:$0 sm:$0xff] (!%p2222_p10) }
 0x3f0   : > { %v2524_v34 = vpack.c.bf16 %v1539_v32, %v1538_v31  ;;  %v1487_v56 = vpop.permute.xlu0 %1486  ;;  %2523 = vmatpush3.bf16.msra.mxu0 %v2520_v29 }
 0x3f1   : > { %v1492_v55 = vpop.permute.xlu1 %1491  ;;  %v1540_v35 = vmul.f32 %v1487_v56, %v3008_v62 }
 0x3f2   : > { %v1541_v57 = vmul.f32 %v3006_v61, %v1492_v55  ;;  %2525 = vmatprep.subr.bf16.mxu0 %v2524_v34 }
 0x3f4   : > { %v2528_v58 = vpack.c.bf16 %v1541_v57, %v1540_v35  ;;  %v1497_v36 = vpop.permute.xlu0 %1496  ;;  %2527 = vmatpush3.bf16.msra.mxu0 %v2524_v34 }
 0x3f5   : > { %v1502_v37 = vpop.permute.xlu1 %1501  ;;  %v1542_v38 = vmul.f32 %v1497_v36, %v3016_v0  ;;  %v2223_v36 = vld [vmem:[%s3212_s9] ss:$0 sm:$0xff] (!%p2222_p10) }
 0x3f6   : > { %v1543_v60 = vmul.f32 %v3014_v63, %v1502_v37  ;;  %2529 = vmatprep.subr.bf16.mxu0 %v2528_v58 }
 0x3f8   : > { %v2532_v59 = vpack.c.bf16 %v1543_v60, %v1542_v38  ;;  %v1507_v39 = vpop.permute.xlu0 %1506  ;;  %2531 = vmatpush3.bf16.msra.mxu0 %v2528_v58 }
 0x3f9   : > { %v1512_v40 = vpop.permute.xlu1 %1511  ;;  %v1544_v41 = vmul.f32 %v1507_v39, %v3024_v2 }
 0x3fa   : > { %v1545_v62 = vmul.f32 %v3022_v1, %v1512_v40  ;;  %2533 = vmatprep.subr.bf16.mxu0 %v2532_v59 }
 0x3fc   : > { %v2536_v61 = vpack.c.bf16 %v1545_v62, %v1544_v41  ;;  %v1517_v42 = vpop.permute.xlu0 %1516  ;;  %2535 = vmatpush3.bf16.msra.mxu0 %v2532_v59 }
 0x3fd   : > { %v1522_v44 = vpop.permute.xlu1 %1521  ;;  %v1546_v45 = vmul.f32 %v1517_v42, %v3032_v4  ;;  %v1450_v4 = vld [vmem:[#allocation4] sm:$0xff] }
 0x3fe   : > { %v1547_v0 = vmul.f32 %v3030_v3, %v1522_v44  ;;  %2537 = vmatprep.subr.bf16.mxu0 %v2536_v61  ;;  %v1451_v3 = vld [vmem:[#allocation4 + $0x8] sm:$0xff] }
 0x400   : > { %v2540_v63 = vpack.c.bf16 %v1547_v0, %v1546_v45  ;;  %v1527_v46 = vpop.permute.xlu0 %1526  ;;  %2539 = vmatpush3.bf16.msra.mxu0 %v2536_v61 }
 0x401   : > { %v1532_v47 = vpop.permute.xlu1 %1531  ;;  %v1548_v48 = vmul.f32 %v1527_v46, %v3040_v6 }
 0x402   : > { %v1549_v2 = vmul.f32 %v3038_v5, %v1532_v47  ;;  %2541 = vmatprep.subr.bf16.mxu0 %v2540_v63 }
 0x404   : > { %v2544_v1 = vpack.c.bf16 %v1549_v2, %v1548_v48  ;;  %2543 = vmatpush3.bf16.msra.mxu0 %v2540_v63 }
 0x406   : > { %2545 = vmatprep.subr.bf16.mxu0 %v2544_v1  ;;  %v1741_v19 = vpop.permute.xlu1 (!%p2222_p10), %1740 }
 0x408   : > { %2547 = vmatpush3.bf16.msra.mxu0 %v2544_v1 }
 0x409   : > { %2549 = vmatprep.subr.bf16.mxu0 %v3050_v15 }
 0x40b   : > { %2456 = vmatmul.mubr.f32.vlgmr.msra.gmra.mrb[16].mxu0 %v1453_v50 }
 0x40c   : > { %2551 = vmatpush3.bf16.msra.mxu0 %v3050_v15  ;;  %2490 = vmatprep.mubr.f32.mxu0 %v1452_v17 }
 0x40d   : > { %2553 = vmatprep.subr.bf16.mxu0 %v3056_v24 }
 0x410   : > { %2555 = vmatpush3.bf16.msra.mxu0 %v3056_v24 }
 0x411   : > { %2557 = vmatprep.subr.bf16.mxu0 %v3062_v33 }
 0x414   : > { %2559 = vmatpush3.bf16.msra.mxu0 %v3062_v33  ;;  %v1630_v33 = vld [vmem:[#allocation5 + $0x8] sm:$0xff] }
 0x415   : > { %2561 = vmatprep.subr.bf16.mxu0 %v3070_v43 }
 0x418   : > { %2563 = vmatpush3.bf16.msra.mxu0 %v3070_v43  ;;  %v1629_v43 = vld [vmem:[#allocation5] sm:$0xff] }
 0x419   : > { %2565 = vmatprep.subr.bf16.mxu0 %v3076_v49 }
 0x41c   : > { %2567 = vmatpush3.bf16.msra.mxu0 %v3076_v49 }
 0x41d   : > { %2569 = vmatprep.subr.bf16.mxu0 %v3082_v8 }
 0x420   : > { %2571 = vmatpush3.bf16.msra.mxu0 %v3082_v8  ;;  %v1735_v8 = vld [vmem:[%s3207_s4 + $0x8] sm:$0xff] (!%p2222_p10) }
 0x421   : > { %2573 = vmatprep.subr.bf16.mxu0 %v3086_v10  ;;  %1745 = vperm.xlu1 (!%p2222_p10), %2700, %v1735_v8  }
 0x424   : > { %2575 = vmatpush3.bf16.msra.mxu0 %v3086_v10 }
 0x425   : > { %2577 = vmatprep.subr.bf16.mxu0 %v3092_v16 }
 0x428   : > { %2579 = vmatpush3.bf16.msra.mxu0 %v3092_v16  ;;  %v1954_v16 = vld [vmem:[%s3215_s12] sm:$0xff] (!%p2222_p10) }
 0x429   : > { %2493 = vmatprep.subr.mxu0 (!%p2222_p10), %v1766_v14 }
 0x42b   : > { %2491 = vmatmul.mubr.f32.vlgmr.msra.gmra.mrb[18].mxu0 %v1453_v50 }
 0x42c   : > { %2494 = vmatpush3.msra.mxu0 (!%p2222_p10), %v1766_v14 }
 0x42d   : > { %2503 = vmatprep.subr.mxu0 (!%p2222_p10), %v1954_v16 }
 0x4a0   : > { %v1746_v26 = vpop.permute.xlu1 (!%p2222_p10), %1745 }
 0x4de   : > { %v2457_v5 = vpop.f32.mrb[16].mxu0 }
 0x4df   : > { %v1626_v6 = vadd.f32 %v2457_v5, %v1451_v3  ;;  %v1616_v15 = vpop.f32.mrb[17].mxu0 }
 0x4e0   : > { %v1625_v24 = vadd.f32 %v1616_v15, %v1450_v4 }
 0x4e1   : > { %1628 = vst.msk [vmem:[#allocation4 + $0x8] sm:$0xff] %vm1095_vm4, %v1626_v6 }
 0x4e2   : > { %1627 = vst.msk [vmem:[#allocation4] sm:$0xff] %vm1095_vm4, %v1625_v24 }
 0x4e8   : > { %v1737_v23 = vld [vmem:[#allocation4 + $0x8] sm:$0xff] (!%p2222_p10) }
 0x4e9   : > { %v1736_v17 = vld [vmem:[#allocation4] sm:$0xff] (!%p2222_p10)  ;;  %v1749_v28 = vmul.f32 (!%p2222_p10), %v1746_v26, %v1737_v23 }
 0x4ea   : > { %v1748_v21 = vmul.f32 (!%p2222_p10), %v1741_v19, %v1736_v17 }
 0x4ec   : > { %2495 = vmatprep.mubr.msk.f32.mxu0 (!%p2222_p10), %vm1095_vm4, %v1748_v21 }
 0x4ed   : > { %2496 = vmatmul.mubr.msk.f32.vlgmr.msra.gmra.mrb[0].mxu0 (!%p2222_p10), %vm1095_vm4, %v1749_v28 }
 0x4ee   : > { %2504 = vmatpush3.msra.mxu0 (!%p2222_p10), %v1954_v16  ;;  %2505 = vmatprep.mubr.msk.f32.mxu0 (!%p2222_p10), %vm1095_vm4, %v1732_v18 }
 0x4f1   : > { %2506 = vmatmul.mubr.msk.f32.vlgmr.msra.gmra.mrb[2].mxu0 (!%p2222_p10), %vm1095_vm4, %v1733_v25 }
 0x4fc   : > { %1731 = sbr.rel (%p2222_p10) target bundleno = 1762 (0x6e2), region = 118 }
 0x4fe   : > { %v2492_v49 = vpop.f32.mrb[18].mxu0 }
 0x4ff   : > { %v1725_v51 = vadd.f32 %v2492_v49, %v1630_v33  ;;  %v1715_v52 = vpop.f32.mrb[19].mxu0 }
 0x500   : > { %v1724_v53 = vadd.f32 %v1715_v52, %v1629_v43 }
 0x501   : > { %1727 = vst.msk [vmem:[#allocation5 + $0x8] sm:$0xff] %vm1433_vm15, %v1725_v51 }
 0x502   : > { %1726 = vst.msk [vmem:[#allocation5] sm:$0xff] %vm1433_vm15, %v1724_v53 }
 0x508   : > { %v1751_v11 = vld [vmem:[#allocation5 + $0x8] sm:$0xff] }
 0x509   : > { %v1750_v7 = vld [vmem:[#allocation5] sm:$0xff]  ;;  %v1753_v12 = vmul.f32 %v1751_v11, %v1735_v8 }
 0x50a   : > { %v1752_v10 = vmul.f32 %v1750_v7, %v1734_v54 }
 0x50c   : > { %1756 = vperm.xlu0 %2699, %v1752_v10  }
 0x510   : > { %1761 = vperm.xlu0 %2699, %v1753_v12  }
 0x58b   : > { %v1757_v20 = vpop.permute.xlu0 %1756 }
 0x58c   : > { %v1764_v22 = vmul.f32 %v1757_v20, %v1732_v18 }
 0x58e   : > { %2500 = vmatprep.mubr.msk.f32.mxu1 %vm1095_vm4, %v1764_v22 }
 0x58f   : > { %v1762_v27 = vpop.permute.xlu0 %1761 }
 0x590   : > { %v1765_v29 = vmul.f32 %v1762_v27, %v1733_v25 }
 0x592   : > { %2501 = vmatmul.mubr.msk.f32.vlgmr.msra.gmra.mrb[0].mxu1 %vm1095_vm4, %v1765_v29  ;;  %vm2040_vm4 = vcmask 261120  }
 0x5c0   : > { %v2497_v31 = vpop.f32.mrb[0].mxu0 }
 0x5c1   : > { %v1846_v34 = vpop.f32.mrb[1].mxu0  ;;  %v1852_v37 = vadd.f32 %v2497_v31, %v2223_v36 }
 0x5c2   : > { %v1847_v38 = vadd.f32 %v2223_v36, %v1846_v34 }
 0x5c4   : > { %v2507_v57 = vpop.f32.mrb[2].mxu0 }
 0x5c5   : > { %v2027_v58 = vpop.f32.mrb[3].mxu0 }
 0x665   : > { %v2502_v32 = vpop.f32.mrb[0].mxu1 }
 0x666   : > { %v1941_v56 = vadd.f32 %v2502_v32, %v2226_v30  ;;  %v1935_v55 = vpop.f32.mrb[1].mxu1 }
 0x667   : > { %v1936_v35 = vadd.f32 %v2226_v30, %v1935_v55 }
 0x668   : > { %1948 = vrot.lane.b32.xlu1 %v1941_v56, %s2758_s15 }
 0x669   : > { %1946 = vrot.lane.b32.xlu0 %v1936_v35, %s2758_s15 }
 0x6da   : > { %v1949_v60 = vpop.permute.xlu1 %1948 }
 0x6db   : > { %v1953_v59 = vsel %vm689_vm3, %v1852_v37, %v1949_v60  ;;  %v1947_v39 = vpop.permute.xlu0 %1946 }
 0x6dc   : > { %v2037_v40 = vadd.f32 %v2507_v57, %v1953_v59  ;;  %v1952_v41 = vsel %vm689_vm3, %v1847_v38, %v1947_v39 }
 0x6dd   : > { %v2036_v62 = vadd.f32 %v2027_v58, %v1952_v41 }
 0x6de   : > { %v2039_v61 = vmax.f32 %v2037_v40, 0.0 }
 0x6df   : > { %v2038_v42 = vmax.f32 %v2036_v62, 0.0 }
 0x6e0   : > { %2042 = vst.msk [vmem:[#allocation7 + $0x8] sm:$0xff] %vm2040_vm4, %v2039_v61 }
 0x6e1   : > { %2041 = vst.msk [vmem:[#allocation7] sm:$0xff] %vm2040_vm4, %v2038_v42 }
 0x6e2 PF: > { %p2600_p11 = scmp.eq.s32.totalorder %s2850_s16, 1  ;;  %s2759_s21 = smov [#allocation7]  }
 0x6e3   : > { %s2054_s20 = sshll.u32 %s2759_s21, 4  ;;  %s2055_s20 = int_to_ptr.vmem [resolvable:$true] %s2054_s20 }
 0x6e4   : > { %s2701_s25 = scalar_lea.vmem %s2055_s20, 256  ;;  %p2708_p1 = scmp.lt.s32.totalorder %s2055_s20, %s2055_s20 }
 0x6e5   : > { %p2702_p12 = scmp.ne.s32.totalorder %s2055_s20, %s2701_s25  ;;  %p2709_p2 = scmp.lt.s32.totalorder %s2701_s25, %s2701_s25 }
 0x6e7   : > { %p2703_p13 = pnand %p2702_p12, %p2600_p11  ;;  %p2710_p3 = por %p2709_p2, %p2708_p1 }
 0x6e9   : > { %p2704_p0 = pneg %p2703_p13 }
 0x6eb   : > { %p2711_p4 = pnand %p2710_p3, %p2704_p0 }
 0x6ed   : > { %2714 = shalt.err (!%p2711_p4)
}
 0x6ee   : > { %s2715_s18 = scalar_lea.hbm %s3216_s13, 256 }
 0x6ef   : > { %p2716_p5 = scmp.ne.s32.totalorder %s3216_s13, %s2715_s18  ;;  %p2721_p8 = scmp.lt.u32.totalorder %s2715_s18, %s3216_s13 }
 0x6f1   : > { %p2717_p6 = pnand %p2716_p5, %p2600_p11 }
 0x6f3   : > { %p2718_p7 = pneg %p2717_p6 }
 0x6f5   : > { %p2723_p9 = pnand %p2721_p8, %p2718_p7 }
 0x6f7   : > { %2726 = shalt.err (!%p2723_p9)
}
 0x6f8   : > { %s2760_s24 = smov 128   ;;  %s2761_s15 = smov 8  }
 0x6f9   : > { %2597 = dma.vmem_to_hbm [thread:$0]  (%p2600_p11), %s2055_s20, 256, %s3216_s13, [#allocation8], %s2760_s24, %s2760_s24, %s2761_s15  }
 0x6fa   : > { %2740 = dma.done.wait (%p2600_p11), [#allocation8], 256  }
 0x6fb   : > { %2742 = vsyncadd (%p2600_p11), [#allocation8], 4294967040 }
 0x6fc PF: > { %s3221_s21 = sld [smem:[#allocation10_spill]]  ;;  %p23_p10 = scmp.ge.s32.totalorder %s2852_s17, 4  }
 0x6fd   : > { %s3222_s29 = smov %s2749_s30  ;;  %s3224_s15 = smov %s2852_s17 }
 0x6fe   :  { %25 = sbr.rel (!%p23_p10) target bundleno = 4 (0x4), region = 168 }
 0x702   : > { %s3223_s30 = smov %s3221_s21 }
 0x705   :  { %2082 = vsyncpa [#allocation8], 1 }
 0x706   :  { %2084 = vsyncpa [#allocation8 + $0x1], 1 }

</bundles_post_ra>
